<compile_context>
chip_gen: v7x
topology: tpu7x:2x2x1
jax: 0.10.0
libtpu: 0.0.40
codegen_flags: <defaults>
</compile_context>

<pallas_src>
import jax
import jax.numpy as jnp
from jax import lax
from jax.experimental import pallas as pl
from jax.experimental.pallas import tpu as pltpu

_EPS = 1e-8                       # torch F.cosine_similarity default eps
_MIB = 1024 * 1024
# Contract the last dim of both operands: ones(1,TD) . x(TM,TD) -> (1,TM) row sums.
_NT = (((1,), (1,)), ((), ()))
# TODO(synk): verify with pl.lower_as_mlir that this dot_general lowers to an MXU
# matmul with an implicit rhs transpose (not an explicit XLU transpose of the full
# (TM, TD) tile); if it does not, switch to x @ ones(TD,1) + a tiny result transpose.


def _row_sums(x):
    """(TM, TD) f32 -> (1, TM) lane-dense row sums on the otherwise-idle MXU."""
    ones = jnp.ones((1, x.shape[-1]), jnp.float32)
    return lax.dot_general(ones, x, _NT, preferred_element_type=jnp.float32)


# -----------------------------------------------------------------------------
# Fused fast path: whole arrays resident in VMEM, single pallas_call.
# -----------------------------------------------------------------------------
def _fused_kernel(a_ref, b_ref, o_ref):
    inv_d = 1.0 / a_ref.shape[-1]
    a = a_ref[...].astype(jnp.float32)
    b = b_ref[...].astype(jnp.float32)
    ma = _row_sums(a) * inv_d            # (1, N): lane j holds mean of row j
    mb = _row_sums(b) * inv_d
    # torch broadcast: element [i, j] gets row-j's mean subtracted.
    # Temporaries are retired early: center a -> w1, center b -> w2, then w12.
    a = a - ma
    w1 = _row_sums(a * a)
    b = b - mb
    w2 = _row_sums(b * b)
    w12 = _row_sums(a * b)
    # F.cosine_similarity: w12 / sqrt(clamp_min(w1*w2, eps^2)); rsqrt+mul = one EUP op.
    # TODO(synk): newer torch clamps each norm separately; differs only for
    # near-zero-variance rows.
    cos = w12 * lax.rsqrt(jnp.maximum(w1 * w2, _EPS * _EPS))
    o_ref[...] = ((cos + 1.0) * 0.5).astype(o_ref.dtype)


# -----------------------------------------------------------------------------
# Tiled path, pass 1: stacked lane-dense (2, N) row means.
# Accumulates directly in the resident output block across the D (k) axis.
# -----------------------------------------------------------------------------
def _make_row_mean_kernel(inv_d):
    def kernel(a_ref, b_ref, m_ref):
        k = pl.program_id(1)

        @pl.when(k == 0)
        def _():
            m_ref[...] = jnp.zeros_like(m_ref)

        m_ref[0:1, :] += _row_sums(a_ref[...].astype(jnp.float32))
        m_ref[1:2, :] += _row_sums(b_ref[...].astype(jnp.float32))

        @pl.when(k == pl.num_programs(1) - 1)
        def _():
            m_ref[...] = m_ref[...] * inv_d

    return kernel


# -----------------------------------------------------------------------------
# Tiled path, pass 2: center (TM, TD) tiles, accumulate w12/w1/w2, finalize.
# -----------------------------------------------------------------------------
def _pearson_tile_kernel(m_ref, a_ref, b_ref, o_ref, w12_ref, w1_ref, w2_ref):
    k = pl.program_id(1)

    @pl.when(k == 0)
    def _():
        w12_ref[...] = jnp.zeros_like(w12_ref)
        w1_ref[...] = jnp.zeros_like(w1_ref)
        w2_ref[...] = jnp.zeros_like(w2_ref)

    # torch broadcast: element [i, j] gets row-j's mean; lane j of this (2, TD)
    # mean slice already holds the mean of row (k*TD + j).
    a = a_ref[...].astype(jnp.float32) - m_ref[0:1, :]
    w1_ref[...] += _row_sums(a * a)          # a*a dead before b is materialized
    b = b_ref[...].astype(jnp.float32) - m_ref[1:2, :]
    w2_ref[...] += _row_sums(b * b)
    w12_ref[...] += _row_sums(a * b)

    @pl.when(k == pl.num_programs(1) - 1)
    def _():
        cos = w12_ref[...] * lax.rsqrt(
            jnp.maximum(w1_ref[...] * w2_ref[...], _EPS * _EPS))
        o_ref[...] = ((cos + 1.0) * 0.5).astype(o_ref.dtype)


# -----------------------------------------------------------------------------
# Generation-aware sizing.
# -----------------------------------------------------------------------------
def _physical_vmem_bytes():
    """Per-TensorCore VMEM, conservatively (fallback = v7x's 64 MiB)."""
    vmem = None
    try:
        info = pltpu.get_tpu_info()
        vmem = int(getattr(info, "vmem_capacity_bytes", 0)) or None
    except Exception:
        vmem = None
    if vmem is None:
        vmem = 64 * _MIB
    try:
        kind = jax.devices()[0].device_kind.lower()
        if "v7" in kind:                     # 2 TCs/chip: force the per-core figure
            vmem = min(vmem, 64 * _MIB)
    except Exception:
        pass
    return vmem


def _divisor_tiles(total, cap):
    """Multiples of 128 that divide `total`, descending, capped at `cap`."""
    tiles = []
    t = (min(cap, total) // 128) * 128
    while t >= 128:
        if total % t == 0:
            tiles.append(t)
        t -= 128
    return tiles


def _fused_fits(n, d, itemsize, phys):
    # Whole a + b resident plus ~4 full-array f32 temporaries, within ~55% of VMEM.
    need = n * d * (2 * itemsize + 4 * 4)
    return need <= (55 * phys) // 100


def _plan(n, d, itemsize, row_tile, d_tile):
    """Pick (row_tile, d_tile, vmem_limit) for the tiled two-pass path."""
    phys = _physical_vmem_bytes()
    big = phys >= 100 * _MIB                      # v5e / v6e (128 MiB physical)
    vmem_limit = (96 if big else 40) * _MIB
    step_budget = (24 if big else 10) * _MIB      # per-grid-step working set (pass 2)
    row_cap = 1024 if big else 512
    # Double-buffered a+b input blocks (4*itemsize) plus ~4 full-tile f32
    # temporaries in the pass-2 body (centered a/b + one product, with slack).
    bytes_per_elem = 4 * itemsize + 4 * 4

    # Reduction (D) tile: whole D unless even a 128-row tile blows the budget.
    if d_tile is not None:
        td = d_tile
    else:
        td = d
        cands = _divisor_tiles(d, d)
        if cands and 128 * d * bytes_per_elem > step_budget:
            fitting = [t for t in cands if 128 * t * bytes_per_elem <= step_budget]
            td = fitting[0] if fitting else cands[-1]
        # TODO(synk): very large D not divisible by 128 forces whole-D blocks here;
        # a padded/masked D-tile would be needed to bound VMEM in that corner case.

    # Row tile: biggest 128-multiple divisor of n within budget/cap, preferring
    # >= 2 tiles so "parallel" can shard across v7x's two TensorCores.
    if row_tile is not None:
        tm = row_tile
    else:
        cap = min(row_cap, max(128, step_budget // (td * bytes_per_elem)))
        if n >= 256:
            cap = min(cap, n // 2)
        cands = _divisor_tiles(n, cap)
        tm = cands[0] if cands else n
    return tm, td, vmem_limit


# -----------------------------------------------------------------------------
# Public wrapper.
# -----------------------------------------------------------------------------
def pearson_correlation(a, b, *, row_tile=None, d_tile=None, fused=None):
    """Pallas implementation of PearsonCorrelation.forward(a, b, dim=-1)."""
    assert a.shape == b.shape and a.ndim == 2
    n, d = a.shape
    assert n == d, "torch's `x - x.mean(-1)` broadcasting requires D == N for 2D inputs"
    out_dtype = a.dtype
    itemsize = jnp.dtype(a.dtype).itemsize
    phys = _physical_vmem_bytes()

    if fused is None:
        fused = (row_tile is None and d_tile is None
                 and _fused_fits(n, d, itemsize, phys))

    if fused:
        big = phys >= 100 * _MIB
        out = pl.pallas_call(
            _fused_kernel,
            out_shape=jax.ShapeDtypeStruct((1, n), out_dtype),
            grid=(1,),
            in_specs=[pl.BlockSpec((n, d), lambda i: (0, 0)),
                      pl.BlockSpec((n, d), lambda i: (0, 0))],
            out_specs=pl.BlockSpec((1, n), lambda i: (0, 0)),
            compiler_params=pltpu.CompilerParams(
                dimension_semantics=("arbitrary",),
                vmem_limit_bytes=(96 if big else 40) * _MIB),
        )(a, b)
        return out[0, :]

    tm, td, vmem_limit = _plan(n, d, itemsize, row_tile, d_tile)
    assert n % tm == 0 and (tm % 128 == 0 or tm == n), f"bad row tile {tm} for n={n}"
    assert d % td == 0 and (td % 128 == 0 or td == d), f"bad d tile {td} for d={d}"
    grid = (n // tm, d // td)                 # reduction axis last, "arbitrary"
    params = pltpu.CompilerParams(
        dimension_semantics=("parallel", "arbitrary"),
        vmem_limit_bytes=vmem_limit,
    )

    # Pass 1: stacked lane-dense (2, N) row means (row 0: a, row 1: b).
    means = pl.pallas_call(
        _make_row_mean_kernel(1.0 / d),
        out_shape=jax.ShapeDtypeStruct((2, n), jnp.float32),
        grid=grid,
        in_specs=[pl.BlockSpec((tm, td), lambda i, k: (i, k)),
                  pl.BlockSpec((tm, td), lambda i, k: (i, k))],
        out_specs=pl.BlockSpec((2, tm), lambda i, k: (0, i)),
        compiler_params=params,
    )(a, b)

    # Pass 2: center tiles against the matching mean slice, accumulate, finalize.
    out = pl.pallas_call(
        _pearson_tile_kernel,
        out_shape=jax.ShapeDtypeStruct((1, n), out_dtype),
        grid=grid,
        in_specs=[pl.BlockSpec((2, td), lambda i, k: (0, k)),   # tiny mean slice
                  pl.BlockSpec((tm, td), lambda i, k: (i, k)),
                  pl.BlockSpec((tm, td), lambda i, k: (i, k))],
        out_specs=pl.BlockSpec((1, tm), lambda i, k: (0, i)),
        scratch_shapes=[pltpu.VMEM((1, tm), jnp.float32)] * 3,   # w12, w1, w2
        compiler_params=params,
    )(means, a, b)
    return out[0, :]


def _reference(a, b):
    """Pure-JAX mirror of the PyTorch forward (same ops, same broadcasting)."""
    a32 = a.astype(jnp.float32)
    b32 = b.astype(jnp.float32)
    a32 = a32 - jnp.mean(a32, axis=-1)   # (N,D) - (N,) broadcasts along last axis
    b32 = b32 - jnp.mean(b32, axis=-1)
    w12 = jnp.sum(a32 * b32, axis=-1)
    w1 = jnp.sum(a32 * a32, axis=-1)
    w2 = jnp.sum(b32 * b32, axis=-1)
    cos = w12 / jnp.sqrt(jnp.maximum(w1 * w2, _EPS * _EPS))
    return ((cos + 1.0) / 2.0).astype(a.dtype)


if __name__ == "__main__":
    key = jax.random.PRNGKey(0)
    ka, kb = jax.random.split(key)
    N = D = 256  # square (required by the torch broadcast), still small
    a = jax.random.normal(ka, (N, D), dtype=jnp.float32)
    b = 0.5 * a + jax.random.normal(kb, (N, D), dtype=jnp.float32)

    ref = jax.block_until_ready(_reference(a, b))

    # Fused fast path: single pallas_call, a/b read from HBM exactly once.
    out_fused = jax.block_until_ready(pearson_correlation(a, b))
    assert out_fused.shape == (N,)
    # 1e-4: MXU f32 multi-pass reductions reorder sums vs the jnp.sum reference.
    assert jnp.allclose(out_fused, ref, atol=1e-4, rtol=1e-4), (out_fused, ref)

    # Tiled path with both row tiling and a D-reduction axis (grid (2, 2)),
    # exercising the accumulator init/finalize logic used for large inputs.
    out_tiled = jax.block_until_ready(
        pearson_correlation(a, b, row_tile=128, d_tile=128, fused=False))
    assert out_tiled.shape == (N,)
    assert jnp.allclose(out_tiled, ref, atol=1e-4, rtol=1e-4), (out_tiled, ref)

    print("KERNEL_OK")
</pallas_src>

<mosaic_0001>
module attributes {stable_mosaic.version = 11 : i64} {
  func.func @_fused_kernel(%arg0: i32, %arg1: memref<256x256xf32, #tpu.memory_space<vmem>>, %arg2: memref<256x256xf32, #tpu.memory_space<vmem>>, %arg3: memref<1x256xf32, #tpu.memory_space<vmem>>) attributes {dimension_semantics = [#tpu.dimension_semantics<arbitrary>], iteration_bounds = array<i64: 1>, scalar_prefetch = 0 : i64, scratch_operands = 0 : i64, tpu.core_type = #tpu.core_type<tc>, window_params = [{pipeline_mode = #tpu.pipeline_mode<synchronous>, transform_indices = @transform_0, window_bounds = array<i64: 256, 256>}, {pipeline_mode = #tpu.pipeline_mode<synchronous>, transform_indices = @transform_1, window_bounds = array<i64: 256, 256>}, {pipeline_mode = #tpu.pipeline_mode<synchronous>, transform_indices = @transform_2, window_bounds = array<i64: 1, 256>}]} {
    %c0 = arith.constant 0 : index
    %c0_0 = arith.constant 0 : index
    %0 = vector.load %arg1[%c0, %c0_0] : memref<256x256xf32, #tpu.memory_space<vmem>>, vector<256x256xf32>
    %c0_1 = arith.constant 0 : index
    %c0_2 = arith.constant 0 : index
    %1 = vector.load %arg2[%c0_1, %c0_2] : memref<256x256xf32, #tpu.memory_space<vmem>>, vector<256x256xf32>
    %cst = arith.constant 1.000000e+00 : f32
    %2 = vector.broadcast %cst : f32 to vector<1x256xf32>
    %cst_3 = arith.constant dense<0.000000e+00> : vector<1x256xf32>
    %3 = tpu.matmul %2, %0, %cst_3 {dimension_numbers = #tpu.dot_dimension_numbers<[1], [1], [0], [0], [0, 0, 1, 0], [], []>} : vector<1x256xf32>, vector<256x256xf32>, vector<1x256xf32> -> vector<1x256xf32>
    %cst_4 = arith.constant 3.906250e-03 : f32
    %4 = vector.broadcast %cst_4 : f32 to vector<1x256xf32>
    %5 = arith.mulf %3, %4 : vector<1x256xf32>
    %cst_5 = arith.constant 1.000000e+00 : f32
    %6 = vector.broadcast %cst_5 : f32 to vector<1x256xf32>
    %cst_6 = arith.constant dense<0.000000e+00> : vector<1x256xf32>
    %7 = tpu.matmul %6, %1, %cst_6 {dimension_numbers = #tpu.dot_dimension_numbers<[1], [1], [0], [0], [0, 0, 1, 0], [], []>} : vector<1x256xf32>, vector<256x256xf32>, vector<1x256xf32> -> vector<1x256xf32>
    %cst_7 = arith.constant 3.906250e-03 : f32
    %8 = vector.broadcast %cst_7 : f32 to vector<1x256xf32>
    %9 = arith.mulf %7, %8 : vector<1x256xf32>
    %10 = vector.broadcast %5 : vector<1x256xf32> to vector<256x256xf32>
    %11 = arith.subf %0, %10 : vector<256x256xf32>
    %12 = arith.mulf %11, %11 : vector<256x256xf32>
    %cst_8 = arith.constant 1.000000e+00 : f32
    %13 = vector.broadcast %cst_8 : f32 to vector<1x256xf32>
    %cst_9 = arith.constant dense<0.000000e+00> : vector<1x256xf32>
    %14 = tpu.matmul %13, %12, %cst_9 {dimension_numbers = #tpu.dot_dimension_numbers<[1], [1], [0], [0], [0, 0, 1, 0], [], []>} : vector<1x256xf32>, vector<256x256xf32>, vector<1x256xf32> -> vector<1x256xf32>
    %15 = vector.broadcast %9 : vector<1x256xf32> to vector<256x256xf32>
    %16 = arith.subf %1, %15 : vector<256x256xf32>
    %17 = arith.mulf %16, %16 : vector<256x256xf32>
    %cst_10 = arith.constant 1.000000e+00 : f32
    %18 = vector.broadcast %cst_10 : f32 to vector<1x256xf32>
    %cst_11 = arith.constant dense<0.000000e+00> : vector<1x256xf32>
    %19 = tpu.matmul %18, %17, %cst_11 {dimension_numbers = #tpu.dot_dimension_numbers<[1], [1], [0], [0], [0, 0, 1, 0], [], []>} : vector<1x256xf32>, vector<256x256xf32>, vector<1x256xf32> -> vector<1x256xf32>
    %20 = arith.mulf %11, %16 : vector<256x256xf32>
    %cst_12 = arith.constant 1.000000e+00 : f32
    %21 = vector.broadcast %cst_12 : f32 to vector<1x256xf32>
    %cst_13 = arith.constant dense<0.000000e+00> : vector<1x256xf32>
    %22 = tpu.matmul %21, %20, %cst_13 {dimension_numbers = #tpu.dot_dimension_numbers<[1], [1], [0], [0], [0, 0, 1, 0], [], []>} : vector<1x256xf32>, vector<256x256xf32>, vector<1x256xf32> -> vector<1x256xf32>
    %23 = arith.mulf %14, %19 : vector<1x256xf32>
    %cst_14 = arith.constant 1.000000e-16 : f32
    %24 = vector.broadcast %cst_14 : f32 to vector<1x256xf32>
    %25 = arith.maximumf %23, %24 : vector<1x256xf32>
    %26 = math.rsqrt %25 : vector<1x256xf32>
    %27 = arith.mulf %22, %26 : vector<1x256xf32>
    %cst_15 = arith.constant 1.000000e+00 : f32
    %28 = vector.broadcast %cst_15 : f32 to vector<1x256xf32>
    %29 = arith.addf %27, %28 : vector<1x256xf32>
    %cst_16 = arith.constant 5.000000e-01 : f32
    %30 = vector.broadcast %cst_16 : f32 to vector<1x256xf32>
    %31 = arith.mulf %29, %30 : vector<1x256xf32>
    %c0_17 = arith.constant 0 : index
    %c0_18 = arith.constant 0 : index
    %32 = vector.load %arg3[%c0_17, %c0_18] : memref<1x256xf32, #tpu.memory_space<vmem>>, vector<1x256xf32>
    tpu.vector_store %arg3[%c0_17, %c0_18], %31 {strides = array<i32>} : memref<1x256xf32, #tpu.memory_space<vmem>>, vector<1x256xf32>,
    return
  }
  func.func @transform_0(%arg0: i32) -> (i32, i32) {
    %c0_i32 = arith.constant 0 : i32
    %c0_i32_0 = arith.constant 0 : i32
    %c0_i32_1 = arith.constant 0 : i32
    return %c0_i32, %c0_i32_0 : i32, i32
  }
  func.func @transform_1(%arg0: i32) -> (i32, i32) {
    %c0_i32 = arith.constant 0 : i32
    %c0_i32_0 = arith.constant 0 : i32
    %c0_i32_1 = arith.constant 0 : i32
    return %c0_i32, %c0_i32_0 : i32, i32
  }
  func.func @transform_2(%arg0: i32) -> (i32, i32) {
    %c0_i32 = arith.constant 0 : i32
    %c0_i32_0 = arith.constant 0 : i32
    %c0_i32_1 = arith.constant 0 : i32
    return %c0_i32, %c0_i32_0 : i32, i32
  }
}

</mosaic_0001>

<bundles_post_ra>
// kernel: tpu_custom_call.1
= control target key start
LH: loop header
LB: loop body
LE: loop exit
PB: predicated region body
PF: predicated region fallthrough
CT: control target
= control target key end

     0   :  { %7 = vsyncpa [#allocation3], 0  ;;  %s2989_s0 = inlined_call_operand.hbm [shape: f32[256,256], index: 0, kind: input, shape index: {}]   ;;  %s2990_s1 = inlined_call_operand.hbm [shape: f32[256,256], index: 1, kind: input, shape index: {}]   ;;  %s2991_s2 = inlined_call_operand.hbm [shape: f32[1,256], index: 2, kind: output, shape index: {}]  }
   0x1   :  { %8 = vsyncpa [#allocation6], 0 }
   0x2   :  { %9 = vsyncpa [#allocation4], 0  ;;  %s1317_s9 = smov [#allocation2]   ;;  %s1245_s13 = scalar_lea.hbm %s2989_s0, 8192 }
   0x3   :  { %s15_s10 = sshll.u32 %s1317_s9, 4  ;;  %p1246_p0 = scmp.ne.s32.totalorder %s2989_s0, %s1245_s13  ;;  %s16_s10 = int_to_ptr.vmem [resolvable:$true] %s15_s10 }
   0x4   :  { %p1249_p1 = scmp.lt.u32.totalorder %s1245_s13, %s2989_s0 }
   0x6   :  { %p1251_p2 = pnand %p1249_p1, %p1246_p0 }
   0x8   :  { %1254 = shalt.err (!%p1251_p2)
}
   0x9   :  { %s1255_s18 = scalar_lea.vmem %s16_s10, 8192  ;;  %p1260_p4 = scmp.lt.s32.totalorder %s16_s10, %s16_s10 }
   0xa   :  { %p1256_p3 = scmp.ne.s32.totalorder %s16_s10, %s1255_s18  ;;  %p1261_p5 = scmp.lt.s32.totalorder %s1255_s18, %s1255_s18 }
   0xc   :  { %p1262_p6 = por %p1261_p5, %p1260_p4 }
   0xe   :  { %p1263_p7 = pnand %p1262_p6, %p1256_p3 }
  0x10   :  { %1266 = shalt.err (!%p1263_p7)
}
  0x11   :  { %s1318_s19 = smov 256   ;;  %s1319_s20 = smov 16  }
  0x12   :  { %21 = dma.hbm_to_vmem [thread:$0]  %s2989_s0, 8192, %s16_s10, [#allocation3], %s1318_s19, %s1318_s19, %s1319_s20  }
  0x13   :  { %s1320_s23 = smov [#allocation5]   ;;  %s1267_s27 = scalar_lea.hbm %s2990_s1, 8192 }
  0x14   :  { %s27_s24 = sshll.u32 %s1320_s23, 4  ;;  %p1268_p8 = scmp.ne.s32.totalorder %s2990_s1, %s1267_s27  ;;  %s28_s24 = int_to_ptr.vmem [resolvable:$true] %s27_s24 }
  0x15   :  { %p1271_p9 = scmp.lt.u32.totalorder %s1267_s27, %s2990_s1 }
  0x17   :  { %p1273_p10 = pnand %p1271_p9, %p1268_p8 }
  0x19   :  { %1276 = shalt.err (!%p1273_p10)
}
  0x1a   :  { %s1277_s4 = scalar_lea.vmem %s28_s24, 8192  ;;  %p1282_p12 = scmp.lt.s32.totalorder %s28_s24, %s28_s24 }
  0x1b   :  { %p1278_p11 = scmp.ne.s32.totalorder %s28_s24, %s1277_s4  ;;  %p1283_p13 = scmp.lt.s32.totalorder %s1277_s4, %s1277_s4 }
  0x1d   :  { %p1284_p0 = por %p1283_p13, %p1282_p12 }
  0x1f   :  { %p1285_p1 = pnand %p1284_p0, %p1278_p11 }
  0x21   :  { %1288 = shalt.err (!%p1285_p1)
}
  0x22   :  { %33 = dma.hbm_to_vmem [thread:$0]  %s2990_s1, 8192, %s28_s24, [#allocation6], %s1318_s19, %s1318_s19, %s1319_s20  }
  0x23   :  { %1311 = dma.done.wait [#allocation3], 8192  }
  0x24   :  { %1312 = vsyncadd [#allocation3], 4294959104 }
  0x25   :  { %1313 = dma.done.wait [#allocation6], 8192  }
  0x26   :  { %1314 = vsyncadd [#allocation6], 4294959104  ;;  %v2992_v0 = vmov 1.0   ;;  %v1365_v1 = vld [vmem:[#allocation2 + $0x8] sm:$0xff]  ;;  %v1367_v2 = vld [vmem:[#allocation2 + $0x18] sm:$0xff]  ;;  %s1323_s1 = smov [#allocation7]  }
  0x27   :  { %232 = vmatprep.mubr.f32.mxu0 %v2992_v0  ;;  %305 = vmatprep.mubr.f32.mxu1 %v2992_v0  ;;  %3197 = vst [vmem:[#allocation11_spill] sm:$0xff] %v1365_v1  ;;  %3198 = vst [vmem:[#allocation12_spill] sm:$0xff] %v1367_v2  ;;  %v1369_v3 = vld [vmem:[#allocation5 + $0x8] sm:$0xff]  ;;  %v914_v4 = vpack.c.bf16 %v1367_v2, %v1365_v1  ;;  %v1373_v5 = vld [vmem:[#allocation5 + $0x18] sm:$0xff]  ;;  %s904_s6 = sshll.u32 %s1323_s1, 4  ;;  %s905_s6 = int_to_ptr.vmem [resolvable:$true] %s904_s6 }
  0x28   :  { %3199 = vst [vmem:[#allocation13_spill] sm:$0xff] %v1369_v3  ;;  %3200 = vst [vmem:[#allocation14_spill] sm:$0xff] %v1373_v5  ;;  %v1375_v6 = vld [vmem:[#allocation2] sm:$0xff]  ;;  %v1377_v7 = vld [vmem:[#allocation2 + $0x10] sm:$0xff]  ;;  %v978_v8 = vpack.c.bf16 %v1373_v5, %v1369_v3  ;;  %s1289_s7 = scalar_lea.vmem %s905_s6, 32  ;;  %p1294_p3 = scmp.lt.s32.totalorder %s905_s6, %s905_s6 }
  0x29   :  { %v916_v9 = vpack.c.bf16 %v1377_v7, %v1375_v6  ;;  %v1383_v10 = vld [vmem:[#allocation5] sm:$0xff]  ;;  %v1385_v11 = vld [vmem:[#allocation5 + $0x10] sm:$0xff]  ;;  %v1387_v12 = vld [vmem:[#allocation2 + $0x28] sm:$0xff]  ;;  %915 = vmatprep.subr.bf16.mxu0 %v914_v4  ;;  %p1290_p2 = scmp.ne.s32.totalorder %s905_s6, %s1289_s7  ;;  %p1295_p4 = scmp.lt.s32.totalorder %s1289_s7, %s1289_s7 }
  0x2a   :  { %3201 = vst [vmem:[#allocation15_spill] sm:$0xff] %v1387_v12  ;;  %v980_v13 = vpack.c.bf16 %v1385_v11, %v1383_v10  ;;  %v1391_v14 = vld [vmem:[#allocation2 + $0x38] sm:$0xff]  ;;  %v1393_v15 = vld [vmem:[#allocation5 + $0x28] sm:$0xff]  ;;  %979 = vmatprep.subr.bf16.mxu1 %v978_v8  ;;  %v1401_v19 = vld [vmem:[#allocation2 + $0x20] sm:$0xff] }
  0x2b   :  { %3202 = vst [vmem:[#allocation16_spill] sm:$0xff] %v1391_v14  ;;  %3203 = vst [vmem:[#allocation17_spill] sm:$0xff] %v1393_v15  ;;  %v1395_v16 = vld [vmem:[#allocation5 + $0x38] sm:$0xff]  ;;  %917 = vmatpush1.bf16.xpose.msra.mxu0 %v916_v9  ;;  %v918_v17 = vpack.c.bf16 %v1391_v14, %v1387_v12  ;;  %v1403_v20 = vld [vmem:[#allocation2 + $0x30] sm:$0xff]  ;;  %p1296_p5 = por %p1295_p4, %p1294_p3 }
  0x2c   :  { %3204 = vst [vmem:[#allocation18_spill] sm:$0xff] %v1395_v16  ;;  %v982_v18 = vpack.c.bf16 %v1395_v16, %v1393_v15  ;;  %981 = vmatpush1.bf16.xpose.msra.mxu1 %v980_v13  ;;  %v1405_v21 = vld [vmem:[#allocation5 + $0x20] sm:$0xff]  ;;  %v1407_v22 = vld [vmem:[#allocation5 + $0x30] sm:$0xff]  ;;  %v1409_v23 = vld [vmem:[#allocation2 + $0x48] sm:$0xff]  ;;  %v920_v27 = vpack.c.bf16 %v1403_v20, %v1401_v19 }
  0x2d   :  { %919 = vmatprep.subr.bf16.mxu0 %v918_v17  ;;  %3205 = vst [vmem:[#allocation19_spill] sm:$0xff] %v1409_v23  ;;  %v1411_v24 = vld [vmem:[#allocation2 + $0x58] sm:$0xff]  ;;  %v1413_v25 = vld [vmem:[#allocation5 + $0x48] sm:$0xff]  ;;  %v984_v28 = vpack.c.bf16 %v1407_v22, %v1405_v21  ;;  %v1425_v31 = vld [vmem:[#allocation2 + $0x40] sm:$0xff]  ;;  %p1297_p6 = pnand %p1296_p5, %p1290_p2 }
  0x2e   :  { %983 = vmatprep.subr.bf16.mxu1 %v982_v18  ;;  %3206 = vst [vmem:[#allocation20_spill] sm:$0xff] %v1411_v24  ;;  %3207 = vst [vmem:[#allocation21_spill] sm:$0xff] %v1413_v25  ;;  %v1415_v26 = vld [vmem:[#allocation5 + $0x58] sm:$0xff]  ;;  %v922_v29 = vpack.c.bf16 %v1411_v24, %v1409_v23  ;;  %v1427_v32 = vld [vmem:[#allocation2 + $0x50] sm:$0xff] }
  0x2f   :  { %3208 = vst [vmem:[#allocation22_spill] sm:$0xff] %v1415_v26  ;;  %v986_v30 = vpack.c.bf16 %v1415_v26, %v1413_v25  ;;  %v1429_v33 = vld [vmem:[#allocation5 + $0x40] sm:$0xff]  ;;  %v1431_v34 = vld [vmem:[#allocation5 + $0x50] sm:$0xff]  ;;  %v1433_v35 = vld [vmem:[#allocation2 + $0x68] sm:$0xff]  ;;  %v924_v39 = vpack.c.bf16 %v1427_v32, %v1425_v31 }
  0x30   :  { %3209 = vst [vmem:[#allocation23_spill] sm:$0xff] %v1433_v35  ;;  %v1435_v36 = vld [vmem:[#allocation2 + $0x78] sm:$0xff]  ;;  %v1437_v37 = vld [vmem:[#allocation5 + $0x68] sm:$0xff]  ;;  %v988_v40 = vpack.c.bf16 %v1431_v34, %v1429_v33  ;;  %v1449_v43 = vld [vmem:[#allocation2 + $0x60] sm:$0xff] }
  0x31   :  { %3210 = vst [vmem:[#allocation24_spill] sm:$0xff] %v1435_v36  ;;  %3211 = vst [vmem:[#allocation25_spill] sm:$0xff] %v1437_v37  ;;  %v1439_v38 = vld [vmem:[#allocation5 + $0x78] sm:$0xff]  ;;  %v926_v41 = vpack.c.bf16 %v1435_v36, %v1433_v35  ;;  %v1451_v44 = vld [vmem:[#allocation2 + $0x70] sm:$0xff] }
  0x32   :  { %3212 = vst [vmem:[#allocation26_spill] sm:$0xff] %v1439_v38  ;;  %v990_v42 = vpack.c.bf16 %v1439_v38, %v1437_v37  ;;  %v1453_v45 = vld [vmem:[#allocation5 + $0x60] sm:$0xff]  ;;  %v1455_v46 = vld [vmem:[#allocation5 + $0x70] sm:$0xff]  ;;  %v1457_v47 = vld [vmem:[#allocation2 + $0x88] sm:$0xff]  ;;  %v928_v51 = vpack.c.bf16 %v1451_v44, %v1449_v43 }
  0x33   :  { %921 = vmatpush1.bf16.xpose.msra.mxu0 %v920_v27  ;;  %3213 = vst [vmem:[#allocation27_spill] sm:$0xff] %v1457_v47  ;;  %v1459_v48 = vld [vmem:[#allocation2 + $0x98] sm:$0xff]  ;;  %v1461_v49 = vld [vmem:[#allocation5 + $0x88] sm:$0xff]  ;;  %v992_v52 = vpack.c.bf16 %v1455_v46, %v1453_v45  ;;  %v1473_v55 = vld [vmem:[#allocation2 + $0x80] sm:$0xff] }
  0x34   :  { %985 = vmatpush1.bf16.xpose.msra.mxu1 %v984_v28  ;;  %923 = vmatprep.subr.bf16.mxu0 %v922_v29  ;;  %3214 = vst [vmem:[#allocation28_spill] sm:$0xff] %v1459_v48  ;;  %3215 = vst [vmem:[#allocation29_spill] sm:$0xff] %v1461_v49  ;;  %v1463_v50 = vld [vmem:[#allocation5 + $0x98] sm:$0xff]  ;;  %v930_v53 = vpack.c.bf16 %v1459_v48, %v1457_v47  ;;  %v1475_v56 = vld [vmem:[#allocation2 + $0x90] sm:$0xff] }
  0x35   :  { %987 = vmatprep.subr.bf16.mxu1 %v986_v30  ;;  %3216 = vst [vmem:[#allocation30_spill] sm:$0xff] %v1463_v50  ;;  %v994_v54 = vpack.c.bf16 %v1463_v50, %v1461_v49  ;;  %v1477_v57 = vld [vmem:[#allocation5 + $0x80] sm:$0xff]  ;;  %v1479_v58 = vld [vmem:[#allocation5 + $0x90] sm:$0xff]  ;;  %v1481_v59 = vld [vmem:[#allocation2 + $0xa8] sm:$0xff]  ;;  %v932_v63 = vpack.c.bf16 %v1475_v56, %v1473_v55 }
  0x36   :  { %3217 = vst [vmem:[#allocation31_spill] sm:$0xff] %v1481_v59  ;;  %v1483_v60 = vld [vmem:[#allocation2 + $0xb8] sm:$0xff]  ;;  %v1485_v61 = vld [vmem:[#allocation5 + $0xa8] sm:$0xff]  ;;  %v996_v4 = vpack.c.bf16 %v1479_v58, %v1477_v57  ;;  %v1497_v13 = vld [vmem:[#allocation2 + $0xa0] sm:$0xff] }
  0x37   :  { %3218 = vst [vmem:[#allocation32_spill] sm:$0xff] %v1483_v60  ;;  %3219 = vst [vmem:[#allocation33_spill] sm:$0xff] %v1485_v61  ;;  %v1487_v62 = vld [vmem:[#allocation5 + $0xb8] sm:$0xff]  ;;  %v934_v8 = vpack.c.bf16 %v1483_v60, %v1481_v59  ;;  %v1499_v17 = vld [vmem:[#allocation2 + $0xb0] sm:$0xff] }
  0x38   :  { %3220 = vst [vmem:[#allocation34_spill] sm:$0xff] %v1487_v62  ;;  %v998_v9 = vpack.c.bf16 %v1487_v62, %v1485_v61  ;;  %v1501_v18 = vld [vmem:[#allocation5 + $0xa0] sm:$0xff]  ;;  %v1503_v27 = vld [vmem:[#allocation5 + $0xb0] sm:$0xff]  ;;  %v1505_v28 = vld [vmem:[#allocation2 + $0xc8] sm:$0xff] }
  0x39   :  { %3221 = vst [vmem:[#allocation35_spill] sm:$0xff] %v1505_v28  ;;  %v1507_v29 = vld [vmem:[#allocation2 + $0xd8] sm:$0xff]  ;;  %v1509_v30 = vld [vmem:[#allocation5 + $0xc8] sm:$0xff]  ;;  %v1549_v62 = vld [vmem:[#allocation5 + $0xe0] sm:$0xff] }
  0x3a   :  { %3222 = vst [vmem:[#allocation36_spill] sm:$0xff] %v1507_v29  ;;  %3223 = vst [vmem:[#allocation37_spill] sm:$0xff] %v1509_v30  ;;  %v1535_v0 = vld [vmem:[#allocation5 + $0xf8] sm:$0xff]  ;;  %v1551_v61 = vld [vmem:[#allocation5 + $0xf0] sm:$0xff] }
  0x3b   :  { %925 = vmatpush1.bf16.xpose.msra.mxu0 %v924_v39  ;;  %v1511_v39 = vld [vmem:[#allocation5 + $0xd8] sm:$0xff]  ;;  %3228 = vst [vmem:[#allocation42_spill] sm:$0xff] %v1535_v0  ;;  %v1553_v50 = vld [vmem:[#allocation2 + $0x108] sm:$0xff]  ;;  %v1597_v60 = vld [vmem:[#allocation5 + $0x120] sm:$0xff] }
  0x3c   :  { %989 = vmatpush1.bf16.xpose.msra.mxu1 %v988_v40  ;;  %927 = vmatprep.subr.bf16.mxu0 %v926_v41  ;;  %3224 = vst [vmem:[#allocation38_spill] sm:$0xff] %v1511_v39  ;;  %v936_v40 = vpack.c.bf16 %v1499_v17, %v1497_v13  ;;  %v1000_v41 = vpack.c.bf16 %v1503_v27, %v1501_v18  ;;  %3229 = vst [vmem:[#allocation43_spill] sm:$0xff] %v1553_v50  ;;  %v1555_v49 = vld [vmem:[#allocation2 + $0x118] sm:$0xff]  ;;  %v1557_v38 = vld [vmem:[#allocation5 + $0x108] sm:$0xff] }
  0x3d   :  { %991 = vmatprep.subr.bf16.mxu1 %v990_v42  ;;  %v938_v42 = vpack.c.bf16 %v1507_v29, %v1505_v28  ;;  %3230 = vst [vmem:[#allocation44_spill] sm:$0xff] %v1555_v49  ;;  %3231 = vst [vmem:[#allocation45_spill] sm:$0xff] %v1557_v38  ;;  %v1559_v37 = vld [vmem:[#allocation5 + $0x118] sm:$0xff]  ;;  %v1577_v29 = vld [vmem:[#allocation2 + $0x128] sm:$0xff] }
  0x3e   :  { %3232 = vst [vmem:[#allocation46_spill] sm:$0xff] %v1559_v37  ;;  %3234 = vst [vmem:[#allocation48_spill] sm:$0xff] %v1577_v29  ;;  %v1579_v28 = vld [vmem:[#allocation2 + $0x138] sm:$0xff]  ;;  %v1599_v59 = vld [vmem:[#allocation5 + $0x130] sm:$0xff] }
  0x3f   :  { %3235 = vst [vmem:[#allocation49_spill] sm:$0xff] %v1579_v28  ;;  %3238 = vst [vmem:[#allocation52_spill] sm:$0xff] %v1597_v60  ;;  %v1601_v48 = vld [vmem:[#allocation2 + $0x148] sm:$0xff]  ;;  %v1603_v47 = vld [vmem:[#allocation2 + $0x158] sm:$0xff] }
  0x40   :  { %3239 = vst [vmem:[#allocation53_spill] sm:$0xff] %v1599_v59  ;;  %3240 = vst [vmem:[#allocation54_spill] sm:$0xff] %v1601_v48  ;;  %v1621_v36 = vld [vmem:[#allocation5 + $0x140] sm:$0xff]  ;;  %v1623_v26 = vld [vmem:[#allocation5 + $0x150] sm:$0xff] }
  0x41   :  { %3241 = vst [vmem:[#allocation55_spill] sm:$0xff] %v1603_v47  ;;  %3244 = vst [vmem:[#allocation58_spill] sm:$0xff] %v1621_v36  ;;  %v1625_v25 = vld [vmem:[#allocation2 + $0x168] sm:$0xff]  ;;  %v1627_v35 = vld [vmem:[#allocation2 + $0x178] sm:$0xff] }
  0x42   :  { %3245 = vst [vmem:[#allocation59_spill] sm:$0xff] %v1623_v26  ;;  %3246 = vst [vmem:[#allocation60_spill] sm:$0xff] %v1625_v25  ;;  %v1645_v24 = vld [vmem:[#allocation5 + $0x160] sm:$0xff]  ;;  %v1647_v23 = vld [vmem:[#allocation5 + $0x170] sm:$0xff] }
  0x43   :  { %929 = vmatpush1.bf16.xpose.msra.mxu0 %v928_v51  ;;  %v1002_v51 = vpack.c.bf16 %v1511_v39, %v1509_v30  ;;  %v1545_v39 = vld [vmem:[#allocation2 + $0xe0] sm:$0xff]  ;;  %v1547_v30 = vld [vmem:[#allocation2 + $0xf0] sm:$0xff]  ;;  %3247 = vst [vmem:[#allocation61_spill] sm:$0xff] %v1627_v35  ;;  %3250 = vst [vmem:[#allocation64_spill] sm:$0xff] %v1645_v24 }
  0x44   :  { %993 = vmatpush1.bf16.xpose.msra.mxu1 %v992_v52  ;;  %931 = vmatprep.subr.bf16.mxu0 %v930_v53  ;;  %v1521_v52 = vld [vmem:[#allocation2 + $0xc0] sm:$0xff]  ;;  %v1523_v53 = vld [vmem:[#allocation2 + $0xd0] sm:$0xff]  ;;  %3251 = vst [vmem:[#allocation65_spill] sm:$0xff] %v1647_v23  ;;  %v1649_v16 = vld [vmem:[#allocation2 + $0x188] sm:$0xff] }
  0x45   :  { %995 = vmatprep.subr.bf16.mxu1 %v994_v54  ;;  %v1525_v54 = vld [vmem:[#allocation5 + $0xc0] sm:$0xff]  ;;  %3252 = vst [vmem:[#allocation66_spill] sm:$0xff] %v1649_v16  ;;  %v1651_v15 = vld [vmem:[#allocation2 + $0x198] sm:$0xff]  ;;  %v1671_v3 = vld [vmem:[#allocation5 + $0x190] sm:$0xff] }
  0x46   :  { %3253 = vst [vmem:[#allocation67_spill] sm:$0xff] %v1651_v15  ;;  %v1669_v5 = vld [vmem:[#allocation5 + $0x180] sm:$0xff]  ;;  %3257 = vst [vmem:[#allocation71_spill] sm:$0xff] %v1671_v3  ;;  %v1673_v14 = vld [vmem:[#allocation2 + $0x1a8] sm:$0xff] }
  0x47   :  { %3256 = vst [vmem:[#allocation70_spill] sm:$0xff] %v1669_v5  ;;  %3258 = vst [vmem:[#allocation72_spill] sm:$0xff] %v1673_v14  ;;  %v1675_v12 = vld [vmem:[#allocation2 + $0x1b8] sm:$0xff]  ;;  %v1693_v2 = vld [vmem:[#allocation5 + $0x1a0] sm:$0xff] }
  0x48   :  { %3259 = vst [vmem:[#allocation73_spill] sm:$0xff] %v1675_v12  ;;  %3262 = vst [vmem:[#allocation76_spill] sm:$0xff] %v1693_v2  ;;  %v1695_v1 = vld [vmem:[#allocation5 + $0x1b0] sm:$0xff] }
  0x49   :  { %3263 = vst [vmem:[#allocation77_spill] sm:$0xff] %v1695_v1 }
  0x4b   :  { %933 = vmatpush1.bf16.xpose.msra.mxu0 %v932_v63  ;;  %v1527_v63 = vld [vmem:[#allocation5 + $0xd0] sm:$0xff] }
  0x4c   :  { %997 = vmatpush1.bf16.xpose.msra.mxu1 %v996_v4  ;;  %935 = vmatprep.subr.bf16.mxu0 %v934_v8  ;;  %v1529_v4 = vld [vmem:[#allocation2 + $0xe8] sm:$0xff]  ;;  %v1531_v8 = vld [vmem:[#allocation2 + $0xf8] sm:$0xff] }
  0x4d   :  { %999 = vmatprep.subr.bf16.mxu1 %v998_v9  ;;  %3225 = vst [vmem:[#allocation39_spill] sm:$0xff] %v1529_v4  ;;  %3226 = vst [vmem:[#allocation40_spill] sm:$0xff] %v1531_v8  ;;  %v1533_v9 = vld [vmem:[#allocation5 + $0xe8] sm:$0xff] }
  0x4e   :  { %3227 = vst [vmem:[#allocation41_spill] sm:$0xff] %v1533_v9 }
  0x53   :  { %937 = vmatpush1.bf16.xpose.msra.mxu0 %v936_v40  ;;  %v940_v40 = vpack.c.bf16 %v1523_v53, %v1521_v52 }
  0x54   :  { %1001 = vmatpush1.bf16.xpose.msra.mxu1 %v1000_v41  ;;  %939 = vmatprep.subr.bf16.mxu0 %v938_v42  ;;  %v1004_v41 = vpack.c.bf16 %v1527_v63, %v1525_v54  ;;  %v942_v42 = vpack.c.bf16 %v1531_v8, %v1529_v4  ;;  %v1573_v8 = vld [vmem:[#allocation5 + $0x100] sm:$0xff]  ;;  %v1575_v4 = vld [vmem:[#allocation5 + $0x110] sm:$0xff] }
  0x55   :  { %1003 = vmatprep.subr.bf16.mxu1 %v1002_v51  ;;  %v1006_v51 = vpack.c.bf16 %v1535_v0, %v1533_v9  ;;  %v1569_v0 = vld [vmem:[#allocation2 + $0x100] sm:$0xff]  ;;  %v1571_v9 = vld [vmem:[#allocation2 + $0x110] sm:$0xff]  ;;  %3233 = vst [vmem:[#allocation47_spill] sm:$0xff] %v1575_v4 }
  0x5b   :  { %941 = vmatpush1.bf16.xpose.msra.mxu0 %v940_v40  ;;  %v944_v40 = vpack.c.bf16 %v1547_v30, %v1545_v39 }
  0x5c   :  { %1005 = vmatpush1.bf16.xpose.msra.mxu1 %v1004_v41  ;;  %943 = vmatprep.subr.bf16.mxu0 %v942_v42  ;;  %v1008_v41 = vpack.c.bf16 %v1551_v61, %v1549_v62  ;;  %v946_v42 = vpack.c.bf16 %v1555_v49, %v1553_v50  ;;  %v1581_v49 = vld [vmem:[#allocation5 + $0x128] sm:$0xff]  ;;  %v1583_v50 = vld [vmem:[#allocation5 + $0x138] sm:$0xff] }
  0x5d   :  { %1007 = vmatprep.subr.bf16.mxu1 %v1006_v51  ;;  %v1010_v51 = vpack.c.bf16 %v1559_v37, %v1557_v38  ;;  %3236 = vst [vmem:[#allocation50_spill] sm:$0xff] %v1581_v49  ;;  %3237 = vst [vmem:[#allocation51_spill] sm:$0xff] %v1583_v50  ;;  %v1593_v37 = vld [vmem:[#allocation2 + $0x120] sm:$0xff]  ;;  %v1595_v38 = vld [vmem:[#allocation2 + $0x130] sm:$0xff] }
  0x63   :  { %945 = vmatpush1.bf16.xpose.msra.mxu0 %v944_v40  ;;  %v948_v40 = vpack.c.bf16 %v1571_v9, %v1569_v0 }
  0x64   :  { %1009 = vmatpush1.bf16.xpose.msra.mxu1 %v1008_v41  ;;  %947 = vmatprep.subr.bf16.mxu0 %v946_v42  ;;  %v1012_v41 = vpack.c.bf16 %v1575_v4, %v1573_v8  ;;  %v950_v42 = vpack.c.bf16 %v1579_v28, %v1577_v29  ;;  %v1605_v28 = vld [vmem:[#allocation5 + $0x148] sm:$0xff]  ;;  %v1607_v29 = vld [vmem:[#allocation5 + $0x158] sm:$0xff] }
  0x65   :  { %1011 = vmatprep.subr.bf16.mxu1 %v1010_v51  ;;  %v1014_v51 = vpack.c.bf16 %v1583_v50, %v1581_v49  ;;  %3242 = vst [vmem:[#allocation56_spill] sm:$0xff] %v1605_v28  ;;  %3243 = vst [vmem:[#allocation57_spill] sm:$0xff] %v1607_v29  ;;  %v1617_v50 = vld [vmem:[#allocation2 + $0x140] sm:$0xff]  ;;  %v1619_v49 = vld [vmem:[#allocation2 + $0x150] sm:$0xff] }
  0x6b   :  { %949 = vmatpush1.bf16.xpose.msra.mxu0 %v948_v40  ;;  %v952_v40 = vpack.c.bf16 %v1595_v38, %v1593_v37 }
  0x6c   :  { %1013 = vmatpush1.bf16.xpose.msra.mxu1 %v1012_v41  ;;  %951 = vmatprep.subr.bf16.mxu0 %v950_v42  ;;  %v1016_v41 = vpack.c.bf16 %v1599_v59, %v1597_v60  ;;  %v954_v42 = vpack.c.bf16 %v1603_v47, %v1601_v48  ;;  %v1629_v47 = vld [vmem:[#allocation5 + $0x168] sm:$0xff]  ;;  %v1631_v48 = vld [vmem:[#allocation5 + $0x178] sm:$0xff] }
  0x6d   :  { %1015 = vmatprep.subr.bf16.mxu1 %v1014_v51  ;;  %v1018_v51 = vpack.c.bf16 %v1607_v29, %v1605_v28  ;;  %3248 = vst [vmem:[#allocation62_spill] sm:$0xff] %v1629_v47  ;;  %3249 = vst [vmem:[#allocation63_spill] sm:$0xff] %v1631_v48  ;;  %v1641_v29 = vld [vmem:[#allocation2 + $0x160] sm:$0xff]  ;;  %v1643_v28 = vld [vmem:[#allocation2 + $0x170] sm:$0xff] }
  0x73   :  { %953 = vmatpush1.bf16.xpose.msra.mxu0 %v952_v40  ;;  %v956_v40 = vpack.c.bf16 %v1619_v49, %v1617_v50 }
  0x74   :  { %1017 = vmatpush1.bf16.xpose.msra.mxu1 %v1016_v41  ;;  %955 = vmatprep.subr.bf16.mxu0 %v954_v42  ;;  %v1020_v41 = vpack.c.bf16 %v1623_v26, %v1621_v36  ;;  %v958_v42 = vpack.c.bf16 %v1627_v35, %v1625_v25  ;;  %v1653_v35 = vld [vmem:[#allocation5 + $0x188] sm:$0xff]  ;;  %v1655_v25 = vld [vmem:[#allocation5 + $0x198] sm:$0xff]  ;;  %v1739_v36 = vld [vmem:[#allocation5 + $0x1f0] sm:$0xff] }
  0x75   :  { %1019 = vmatprep.subr.bf16.mxu1 %v1018_v51  ;;  %v1022_v51 = vpack.c.bf16 %v1631_v48, %v1629_v47  ;;  %3254 = vst [vmem:[#allocation68_spill] sm:$0xff] %v1653_v35  ;;  %3255 = vst [vmem:[#allocation69_spill] sm:$0xff] %v1655_v25  ;;  %v1665_v48 = vld [vmem:[#allocation2 + $0x180] sm:$0xff]  ;;  %v1667_v47 = vld [vmem:[#allocation2 + $0x190] sm:$0xff] }
  0x76   :  { %v1721_v26 = vld [vmem:[#allocation2 + $0x1e8] sm:$0xff]  ;;  %3275 = vst [vmem:[#allocation89_spill] sm:$0xff] %v1739_v36 }
  0x77   :  { %3270 = vst [vmem:[#allocation84_spill] sm:$0xff] %v1721_v26 }
  0x7b   :  { %957 = vmatpush1.bf16.xpose.msra.mxu0 %v956_v40  ;;  %v960_v40 = vpack.c.bf16 %v1643_v28, %v1641_v29 }
  0x7c   :  { %1021 = vmatpush1.bf16.xpose.msra.mxu1 %v1020_v41  ;;  %959 = vmatprep.subr.bf16.mxu0 %v958_v42  ;;  %v1024_v41 = vpack.c.bf16 %v1647_v23, %v1645_v24  ;;  %v962_v42 = vpack.c.bf16 %v1651_v15, %v1649_v16  ;;  %v1677_v15 = vld [vmem:[#allocation5 + $0x1a8] sm:$0xff]  ;;  %v1679_v16 = vld [vmem:[#allocation5 + $0x1b8] sm:$0xff]  ;;  %v1719_v24 = vld [vmem:[#allocation5 + $0x1d0] sm:$0xff] }
  0x7d   :  { %1023 = vmatprep.subr.bf16.mxu1 %v1022_v51  ;;  %v1026_v51 = vpack.c.bf16 %v1655_v25, %v1653_v35  ;;  %3260 = vst [vmem:[#allocation74_spill] sm:$0xff] %v1677_v15  ;;  %3261 = vst [vmem:[#allocation75_spill] sm:$0xff] %v1679_v16  ;;  %v1689_v25 = vld [vmem:[#allocation2 + $0x1a0] sm:$0xff]  ;;  %v1691_v35 = vld [vmem:[#allocation2 + $0x1b0] sm:$0xff] }
  0x7e   :  { %v1697_v23 = vld [vmem:[#allocation2 + $0x1c8] sm:$0xff]  ;;  %3269 = vst [vmem:[#allocation83_spill] sm:$0xff] %v1719_v24 }
  0x7f   :  { %3264 = vst [vmem:[#allocation78_spill] sm:$0xff] %v1697_v23 }
  0x83   :  { %961 = vmatpush1.bf16.xpose.msra.mxu0 %v960_v40  ;;  %v964_v40 = vpack.c.bf16 %v1667_v47, %v1665_v48 }
  0x84   :  { %1025 = vmatpush1.bf16.xpose.msra.mxu1 %v1024_v41  ;;  %963 = vmatprep.subr.bf16.mxu0 %v962_v42  ;;  %v1028_v41 = vpack.c.bf16 %v1671_v3, %v1669_v5  ;;  %v966_v42 = vpack.c.bf16 %v1675_v12, %v1673_v14  ;;  %v1699_v3 = vld [vmem:[#allocation2 + $0x1d8] sm:$0xff]  ;;  %v1701_v12 = vld [vmem:[#allocation5 + $0x1c8] sm:$0xff]  ;;  %v1717_v5 = vld [vmem:[#allocation5 + $0x1c0] sm:$0xff] }
  0x85   :  { %1027 = vmatprep.subr.bf16.mxu1 %v1026_v51  ;;  %v1030_v51 = vpack.c.bf16 %v1679_v16, %v1677_v15  ;;  %3265 = vst [vmem:[#allocation79_spill] sm:$0xff] %v1699_v3  ;;  %3266 = vst [vmem:[#allocation80_spill] sm:$0xff] %v1701_v12  ;;  %v1703_v14 = vld [vmem:[#allocation5 + $0x1d8] sm:$0xff]  ;;  %v1713_v16 = vld [vmem:[#allocation2 + $0x1c0] sm:$0xff] }
  0x86   :  { %3267 = vst [vmem:[#allocation81_spill] sm:$0xff] %v1703_v14  ;;  %v1715_v15 = vld [vmem:[#allocation2 + $0x1d0] sm:$0xff]  ;;  %3268 = vst [vmem:[#allocation82_spill] sm:$0xff] %v1717_v5 }
  0x8b   :  { %965 = vmatpush1.bf16.xpose.msra.mxu0 %v964_v40  ;;  %v968_v40 = vpack.c.bf16 %v1691_v35, %v1689_v25 }
  0x8c   :  { %1029 = vmatpush1.bf16.xpose.msra.mxu1 %v1028_v41  ;;  %967 = vmatprep.subr.bf16.mxu0 %v966_v42  ;;  %v1032_v41 = vpack.c.bf16 %v1695_v1, %v1693_v2  ;;  %v970_v42 = vpack.c.bf16 %v1699_v3, %v1697_v23  ;;  %v1723_v1 = vld [vmem:[#allocation2 + $0x1f8] sm:$0xff]  ;;  %v1725_v3 = vld [vmem:[#allocation5 + $0x1e8] sm:$0xff]  ;;  %v1737_v2 = vld [vmem:[#allocation5 + $0x1e0] sm:$0xff] }
  0x8d   :  { %1031 = vmatprep.subr.bf16.mxu1 %v1030_v51  ;;  %v1034_v51 = vpack.c.bf16 %v1703_v14, %v1701_v12  ;;  %3271 = vst [vmem:[#allocation85_spill] sm:$0xff] %v1723_v1  ;;  %3272 = vst [vmem:[#allocation86_spill] sm:$0xff] %v1725_v3  ;;  %v1727_v23 = vld [vmem:[#allocation5 + $0x1f8] sm:$0xff]  ;;  %v100_v14 = vld [vmem:[#allocation2 + $0x1e0] sm:$0xff] }
  0x8e   :  { %3273 = vst [vmem:[#allocation87_spill] sm:$0xff] %v1727_v23  ;;  %v102_v12 = vld [vmem:[#allocation2 + $0x1f0] sm:$0xff]  ;;  %3274 = vst [vmem:[#allocation88_spill] sm:$0xff] %v1737_v2 }
  0x8f   :  { %v976_v59 = vpack.c.bf16 %v102_v12, %v100_v14 }
  0x93   :  { %969 = vmatpush1.bf16.xpose.msra.mxu0 %v968_v40  ;;  %v972_v40 = vpack.c.bf16 %v1715_v15, %v1713_v16 }
  0x94   :  { %1033 = vmatpush1.bf16.xpose.msra.mxu1 %v1032_v41  ;;  %971 = vmatprep.subr.bf16.mxu0 %v970_v42  ;;  %v1036_v41 = vpack.c.bf16 %v1719_v24, %v1717_v5  ;;  %v974_v42 = vpack.c.bf16 %v1723_v1, %v1721_v26  ;;  %v1040_v24 = vpack.c.bf16 %v1739_v36, %v1737_v2  ;;  %v3276_v1 = vmov 1.0  }
  0x95   :  { %1035 = vmatprep.subr.bf16.mxu1 %v1034_v51  ;;  %v1038_v51 = vpack.c.bf16 %v1727_v23, %v1725_v3  ;;  %v3074_v23 = vlaneseq }
  0x97   :  { %v1748_v3 = vshrl.u32 %v3074_v23, 7 }
  0x99   :  { %3277 = vst [vmem:[#allocation90_spill] sm:$0xff] %v1748_v3 }
  0x9b   :  { %973 = vmatpush1.bf16.xpose.msra.mxu0 %v972_v40 }
  0x9c   :  { %1037 = vmatpush1.bf16.xpose.msra.mxu1 %v1036_v41  ;;  %975 = vmatprep.subr.bf16.mxu0 %v974_v42 }
  0x9d   :  { %1039 = vmatprep.subr.bf16.mxu1 %v1038_v51 }
  0xa3   :  { %977 = vmatpush1.bf16.xpose.msra.mxu0 %v976_v59  ;;  %v1751_v59 = vsub.s32 0, %v1748_v3  ;;  %v3312_v3 = vld [vmem:[#allocation64_spill] sm:$0xff] }
  0xa4   :  { %1041 = vmatpush1.bf16.xpose.msra.mxu1 %v1040_v24 }
  0xa5   :  { %3278 = vst [vmem:[#allocation91_spill] sm:$0xff] %v1751_v59 }
  0xaa   :  { %233 = vmatmul.mubr.f32.vlgmr.msra.gmra.mrb[0].mxu0 %v3276_v1 }
  0xab   :  { %306 = vmatmul.mubr.f32.vlgmr.msra.gmra.mrb[0].mxu1 %v3276_v1  ;;  %514 = vmatprep.mubr.f32.mxu0 %v3276_v1 }
  0xac   :  { %721 = vmatprep.mubr.f32.mxu1 %v3276_v1 }
 0x17d   :  { %v234_v40 = vpop.f32.mrb[0].mxu0 }
 0x17e   :  { %v307_v41 = vpop.f32.mrb[0].mxu1  ;;  %v236_v42 = vpop.f32.mrb[1].mxu0  ;;  %v239_v26 = vmul.f32 0.00390625, %v234_v40 }
 0x17f   :  { %v309_v51 = vpop.f32.mrb[1].mxu1  ;;  %v312_v24 = vmul.f32 0.00390625, %v307_v41  ;;  %v240_v36 = vmul.f32 0.00390625, %v236_v42 }
 0x180   :  { %v317_v2 = vrot.slane %v239_v26, %v1751_v59  ;;  %v1760_v60 = vmul.f32 0.00390625, %v309_v51 }
 0x181   :  { %v1755_v5 = vrot.slane %v312_v24, %v1751_v59  ;;  %v1758_v1 = vrot.slane %v240_v36, %v1751_v59  ;;  %v3310_v24 = vld [vmem:[#allocation59_spill] sm:$0xff]  ;;  %v3316_v59 = vld [vmem:[#allocation70_spill] sm:$0xff] }
 0x182   :  { %3280 = vst [vmem:[#allocation93_spill] sm:$0xff] %v1760_v60  ;;  %v1763_v4 = vsub.f32 %v1375_v6, %v317_v2  ;;  %v1766_v40 = vsub.f32 %v1377_v7, %v317_v2  ;;  %v1769_v23 = vsub.f32 %v1401_v19, %v317_v2  ;;  %v1772_v41 = vsub.f32 %v1403_v20, %v317_v2  ;;  %v3314_v60 = vld [vmem:[#allocation65_spill] sm:$0xff] }
 0x183   :  { %3279 = vst [vmem:[#allocation92_spill] sm:$0xff] %v1758_v1  ;;  %v1775_v26 = vsub.f32 %v1425_v31, %v317_v2  ;;  %v1778_v36 = vsub.f32 %v1427_v32, %v317_v2  ;;  %v1781_v42 = vsub.f32 %v1449_v43, %v317_v2  ;;  %v1784_v6 = vsub.f32 %v1451_v44, %v317_v2  ;;  %v3318_v1 = vld [vmem:[#allocation71_spill] sm:$0xff] }
 0x184   :  { %v1787_v7 = vsub.f32 %v1473_v55, %v317_v2  ;;  %v1790_v19 = vsub.f32 %v1475_v56, %v317_v2  ;;  %v1793_v20 = vsub.f32 %v1497_v13, %v317_v2  ;;  %v1796_v31 = vsub.f32 %v1499_v17, %v317_v2 }
 0x185   :  { %v1799_v32 = vsub.f32 %v1521_v52, %v317_v2  ;;  %v1802_v43 = vsub.f32 %v1523_v53, %v317_v2  ;;  %v1805_v44 = vsub.f32 %v1545_v39, %v317_v2  ;;  %v1808_v55 = vsub.f32 %v1547_v30, %v317_v2 }
 0x186   :  { %v1811_v56 = vsub.f32 %v1569_v0, %v317_v2  ;;  %v1814_v13 = vsub.f32 %v1571_v9, %v317_v2  ;;  %v1817_v17 = vsub.f32 %v1593_v37, %v317_v2  ;;  %v1820_v52 = vsub.f32 %v1595_v38, %v317_v2 }
 0x187   :  { %3281 = vst [vmem:[#allocation94_spill] sm:$0xff] %v1805_v44  ;;  %3282 = vst [vmem:[#allocation95_spill] sm:$0xff] %v1808_v55  ;;  %v1823_v53 = vsub.f32 %v1617_v50, %v317_v2  ;;  %v1826_v39 = vsub.f32 %v1619_v49, %v317_v2  ;;  %v1829_v30 = vsub.f32 %v1641_v29, %v317_v2 }
 0x188   :  { %3283 = vst [vmem:[#allocation96_spill] sm:$0xff] %v1811_v56  ;;  %3284 = vst [vmem:[#allocation97_spill] sm:$0xff] %v1814_v13  ;;  %v1832_v0 = vsub.f32 %v1643_v28, %v317_v2  ;;  %v1835_v9 = vsub.f32 %v1665_v48, %v317_v2  ;;  %v1838_v37 = vsub.f32 %v1667_v47, %v317_v2 }
 0x189   :  { %3285 = vst [vmem:[#allocation98_spill] sm:$0xff] %v1817_v17  ;;  %3286 = vst [vmem:[#allocation99_spill] sm:$0xff] %v1820_v52  ;;  %v1841_v38 = vsub.f32 %v1689_v25, %v317_v2  ;;  %v1844_v50 = vsub.f32 %v1691_v35, %v317_v2  ;;  %v1847_v49 = vsub.f32 %v1713_v16, %v317_v2 }
 0x18a   :  { %3287 = vst [vmem:[#allocation100_spill] sm:$0xff] %v1823_v53  ;;  %3288 = vst [vmem:[#allocation101_spill] sm:$0xff] %v1826_v39  ;;  %v1850_v29 = vsub.f32 %v1715_v15, %v317_v2  ;;  %v1852_v28 = vsub.f32 %v100_v14, %v317_v2  ;;  %v1854_v51 = vsub.f32 %v102_v12, %v317_v2 }
 0x18b   :  { %3289 = vst [vmem:[#allocation102_spill] sm:$0xff] %v1829_v30  ;;  %3290 = vst [vmem:[#allocation103_spill] sm:$0xff] %v1832_v0  ;;  %v1858_v47 = vsub.f32 %v1383_v10, %v1755_v5  ;;  %v1862_v25 = vsub.f32 %v1385_v11, %v1755_v5  ;;  %v1866_v35 = vsub.f32 %v1405_v21, %v1755_v5 }
 0x18c   :  { %3291 = vst [vmem:[#allocation104_spill] sm:$0xff] %v1835_v9  ;;  %3292 = vst [vmem:[#allocation105_spill] sm:$0xff] %v1838_v37  ;;  %v1870_v15 = vsub.f32 %v1407_v22, %v1755_v5  ;;  %v1874_v2 = vsub.f32 %v1429_v33, %v1755_v5  ;;  %v1878_v10 = vsub.f32 %v1431_v34, %v1755_v5 }
 0x18d   :  { %3293 = vst [vmem:[#allocation106_spill] sm:$0xff] %v1841_v38  ;;  %3294 = vst [vmem:[#allocation107_spill] sm:$0xff] %v1844_v50  ;;  %v1882_v11 = vsub.f32 %v1453_v45, %v1755_v5  ;;  %v1886_v12 = vsub.f32 %v1455_v46, %v1755_v5  ;;  %v1890_v14 = vsub.f32 %v1477_v57, %v1755_v5  ;;  %v3302_v57 = vld [vmem:[#allocation47_spill] sm:$0xff]  ;;  %v3328_v50 = vld [vmem:[#allocation88_spill] sm:$0xff] }
 0x18e   :  { %3295 = vst [vmem:[#allocation108_spill] sm:$0xff] %v1847_v49  ;;  %3296 = vst [vmem:[#allocation109_spill] sm:$0xff] %v1850_v29  ;;  %v1894_v16 = vsub.f32 %v1479_v58, %v1755_v5  ;;  %v1898_v21 = vsub.f32 %v1501_v18, %v1755_v5  ;;  %v1902_v22 = vsub.f32 %v1503_v27, %v1755_v5  ;;  %v3304_v18 = vld [vmem:[#allocation52_spill] sm:$0xff]  ;;  %v3324_v29 = vld [vmem:[#allocation82_spill] sm:$0xff] }
 0x18f   :  { %3297 = vst [vmem:[#allocation110_spill] sm:$0xff] %v1852_v28  ;;  %3298 = vst [vmem:[#allocation111_spill] sm:$0xff] %v1854_v51  ;;  %v1906_v33 = vsub.f32 %v1525_v54, %v1755_v5  ;;  %v1910_v34 = vsub.f32 %v1527_v63, %v1755_v5  ;;  %v1914_v45 = vsub.f32 %v1549_v62, %v1755_v5  ;;  %v3306_v54 = vld [vmem:[#allocation53_spill] sm:$0xff]  ;;  %v3308_v63 = vld [vmem:[#allocation58_spill] sm:$0xff] }
 0x190   :  { %v1918_v46 = vsub.f32 %v1551_v61, %v1755_v5  ;;  %v1922_v48 = vsub.f32 %v1573_v8, %v1755_v5  ;;  %v1926_v58 = vsub.f32 %v3302_v57, %v1755_v5  ;;  %v1930_v27 = vsub.f32 %v3304_v18, %v1755_v5  ;;  %v3320_v51 = vld [vmem:[#allocation76_spill] sm:$0xff]  ;;  %v3322_v28 = vld [vmem:[#allocation77_spill] sm:$0xff]  ;;  %v3326_v49 = vld [vmem:[#allocation83_spill] sm:$0xff] }
 0x191   :  { %3299 = vst [vmem:[#allocation112_spill] sm:$0xff] %v1914_v45  ;;  %v1934_v62 = vsub.f32 %v3306_v54, %v1755_v5  ;;  %v1938_v61 = vsub.f32 %v3308_v63, %v1755_v5  ;;  %v1942_v8 = vsub.f32 %v3310_v24, %v1755_v5  ;;  %v1946_v57 = vsub.f32 %v3312_v3, %v1755_v5  ;;  %v3330_v38 = vld [vmem:[#allocation89_spill] sm:$0xff] }
 0x192   :  { %3300 = vst [vmem:[#allocation113_spill] sm:$0xff] %v1918_v46  ;;  %3301 = vst [vmem:[#allocation114_spill] sm:$0xff] %v1922_v48  ;;  %v1950_v18 = vsub.f32 %v3314_v60, %v1755_v5  ;;  %v1954_v54 = vsub.f32 %v3316_v59, %v1755_v5  ;;  %v1958_v63 = vsub.f32 %v3318_v1, %v1755_v5 }
 0x193   :  { %3303 = vst [vmem:[#allocation47_spill] sm:$0xff] %v1926_v58  ;;  %3305 = vst [vmem:[#allocation52_spill] sm:$0xff] %v1930_v27  ;;  %v1962_v24 = vsub.f32 %v3320_v51, %v1755_v5  ;;  %v1966_v3 = vsub.f32 %v3322_v28, %v1755_v5  ;;  %v1970_v60 = vsub.f32 %v3324_v29, %v1755_v5 }
 0x194   :  { %3307 = vst [vmem:[#allocation53_spill] sm:$0xff] %v1934_v62  ;;  %3309 = vst [vmem:[#allocation58_spill] sm:$0xff] %v1938_v61  ;;  %v1974_v59 = vsub.f32 %v3326_v49, %v1755_v5  ;;  %v1978_v1 = vsub.f32 %v3328_v50, %v1755_v5  ;;  %v1982_v51 = vsub.f32 %v3330_v38, %v1755_v5 }
 0x195   :  { %3311 = vst [vmem:[#allocation59_spill] sm:$0xff] %v1942_v8  ;;  %3313 = vst [vmem:[#allocation64_spill] sm:$0xff] %v1946_v57  ;;  %v1986_v28 = vmul.f32 %v1858_v47, %v1763_v4  ;;  %v1990_v29 = vmul.f32 %v1862_v25, %v1766_v40  ;;  %v1994_v49 = vmul.f32 %v1866_v35, %v1769_v23 }
 0x196   :  { %3315 = vst [vmem:[#allocation65_spill] sm:$0xff] %v1950_v18  ;;  %3317 = vst [vmem:[#allocation70_spill] sm:$0xff] %v1954_v54  ;;  %v1998_v50 = vmul.f32 %v1870_v15, %v1772_v41  ;;  %v2002_v5 = vmul.f32 %v1874_v2, %v1775_v26  ;;  %v2006_v38 = vmul.f32 %v1878_v10, %v1778_v36 }
 0x197   :  { %3319 = vst [vmem:[#allocation71_spill] sm:$0xff] %v1958_v63  ;;  %3321 = vst [vmem:[#allocation76_spill] sm:$0xff] %v1962_v24 }
 0x198   :  { %3323 = vst [vmem:[#allocation77_spill] sm:$0xff] %v1966_v3  ;;  %3325 = vst [vmem:[#allocation82_spill] sm:$0xff] %v1970_v60 }
 0x199   :  { %3327 = vst [vmem:[#allocation83_spill] sm:$0xff] %v1974_v59  ;;  %3329 = vst [vmem:[#allocation88_spill] sm:$0xff] %v1978_v1 }
 0x19a   :  { %3331 = vst [vmem:[#allocation89_spill] sm:$0xff] %v1982_v51  ;;  %3332 = vst [vmem:[#allocation115_spill] sm:$0xff] %v1986_v28  ;;  %v2010_v28 = vmul.f32 %v1882_v11, %v1781_v42 }
 0x19b   :  { %3333 = vst [vmem:[#allocation116_spill] sm:$0xff] %v1990_v29  ;;  %3334 = vst [vmem:[#allocation117_spill] sm:$0xff] %v1994_v49  ;;  %v2014_v29 = vmul.f32 %v1886_v12, %v1784_v6  ;;  %v2018_v49 = vmul.f32 %v1890_v14, %v1787_v7 }
 0x19c   :  { %3335 = vst [vmem:[#allocation118_spill] sm:$0xff] %v1998_v50  ;;  %3336 = vst [vmem:[#allocation119_spill] sm:$0xff] %v2002_v5  ;;  %v2022_v50 = vmul.f32 %v1894_v16, %v1790_v19  ;;  %v2026_v5 = vmul.f32 %v1898_v21, %v1793_v20 }
 0x19d   :  { %3337 = vst [vmem:[#allocation120_spill] sm:$0xff] %v2006_v38  ;;  %3338 = vst [vmem:[#allocation121_spill] sm:$0xff] %v2010_v28  ;;  %v2030_v38 = vmul.f32 %v1902_v22, %v1796_v31  ;;  %v2034_v28 = vmul.f32 %v1906_v33, %v1799_v32 }
 0x19e   :  { %3339 = vst [vmem:[#allocation122_spill] sm:$0xff] %v2014_v29  ;;  %3340 = vst [vmem:[#allocation123_spill] sm:$0xff] %v2018_v49  ;;  %v2038_v29 = vmul.f32 %v1910_v34, %v1802_v43  ;;  %v2042_v49 = vmul.f32 %v1914_v45, %v1805_v44  ;;  %v2062_v45 = vmul.f32 %v1934_v62, %v1820_v52  ;;  %v3371_v52 = vld [vmem:[#allocation11_spill] sm:$0xff] }
 0x19f   :  { %3341 = vst [vmem:[#allocation124_spill] sm:$0xff] %v2022_v50  ;;  %3342 = vst [vmem:[#allocation125_spill] sm:$0xff] %v2026_v5  ;;  %v2046_v50 = vmul.f32 %v1918_v46, %v1808_v55  ;;  %v2050_v5 = vmul.f32 %v1922_v48, %v1811_v56  ;;  %v2066_v46 = vmul.f32 %v1938_v61, %v1823_v53  ;;  %v3358_v53 = vld [vmem:[#allocation106_spill] sm:$0xff] }
 0x1a0   :  { %3343 = vst [vmem:[#allocation126_spill] sm:$0xff] %v2030_v38  ;;  %3344 = vst [vmem:[#allocation127_spill] sm:$0xff] %v2034_v28  ;;  %v2054_v38 = vmul.f32 %v1926_v58, %v1814_v13  ;;  %v2058_v28 = vmul.f32 %v1930_v27, %v1817_v17  ;;  %v2070_v48 = vmul.f32 %v1942_v8, %v1826_v39  ;;  %v3360_v39 = vld [vmem:[#allocation107_spill] sm:$0xff] }
 0x1a1   :  { %3345 = vst [vmem:[#allocation128_spill] sm:$0xff] %v2038_v29  ;;  %3346 = vst [vmem:[#allocation129_spill] sm:$0xff] %v2042_v49  ;;  %v2074_v58 = vmul.f32 %v1946_v57, %v1829_v30  ;;  %v2078_v27 = vmul.f32 %v1950_v18, %v1832_v0  ;;  %v2082_v62 = vmul.f32 %v1954_v54, %v1835_v9  ;;  %v3362_v30 = vld [vmem:[#allocation108_spill] sm:$0xff]  ;;  %v3364_v0 = vld [vmem:[#allocation109_spill] sm:$0xff] }
 0x1a2   :  { %3347 = vst [vmem:[#allocation130_spill] sm:$0xff] %v2046_v50  ;;  %3348 = vst [vmem:[#allocation131_spill] sm:$0xff] %v2050_v5  ;;  %v2086_v61 = vmul.f32 %v1958_v63, %v1838_v37  ;;  %v2090_v8 = vmul.f32 %v1962_v24, %v3358_v53  ;;  %v2094_v57 = vmul.f32 %v1966_v3, %v3360_v39  ;;  %v3366_v9 = vld [vmem:[#allocation110_spill] sm:$0xff]  ;;  %v3368_v37 = vld [vmem:[#allocation111_spill] sm:$0xff] }
 0x1a3   :  { %3349 = vst [vmem:[#allocation132_spill] sm:$0xff] %v2054_v38  ;;  %3350 = vst [vmem:[#allocation133_spill] sm:$0xff] %v2058_v28  ;;  %v2098_v18 = vmul.f32 %v1970_v60, %v3362_v30  ;;  %v2102_v54 = vmul.f32 %v1974_v59, %v3364_v0  ;;  %v2106_v63 = vmul.f32 %v1978_v1, %v3366_v9  ;;  %v3370_v53 = vld [vmem:[#allocation92_spill] sm:$0xff]  ;;  %v3373_v60 = vld [vmem:[#allocation91_spill] sm:$0xff] }
 0x1a4   :  { %3351 = vst [vmem:[#allocation134_spill] sm:$0xff] %v2062_v45  ;;  %3352 = vst [vmem:[#allocation135_spill] sm:$0xff] %v2066_v46  ;;  %v2110_v24 = vmul.f32 %v1982_v51, %v3368_v37  ;;  %v323_v3 = vsub.f32 %v3371_v52, %v3370_v53  ;;  %v3372_v39 = vld [vmem:[#allocation12_spill] sm:$0xff]  ;;  %v3374_v30 = vld [vmem:[#allocation93_spill] sm:$0xff]  ;;  %v386_v59 = vmul.f32 %v1763_v4, %v1763_v4 }
 0x1a5   :  { %3353 = vst [vmem:[#allocation136_spill] sm:$0xff] %v2070_v48  ;;  %3354 = vst [vmem:[#allocation137_spill] sm:$0xff] %v2074_v58  ;;  %v325_v17 = vsub.f32 %v3372_v39, %v3370_v53  ;;  %v2118_v13 = vrot.slane %v3374_v30, %v3373_v60  ;;  %v388_v1 = vmul.f32 %v1766_v40, %v1766_v40  ;;  %v3375_v9 = vld [vmem:[#allocation15_spill] sm:$0xff]  ;;  %v3376_v37 = vld [vmem:[#allocation16_spill] sm:$0xff] }
 0x1a6   :  { %3355 = vst [vmem:[#allocation138_spill] sm:$0xff] %v2078_v27  ;;  %3356 = vst [vmem:[#allocation139_spill] sm:$0xff] %v2082_v62  ;;  %v2126_v51 = vsub.f32 %v3375_v9, %v3370_v53  ;;  %v2130_v52 = vsub.f32 %v3376_v37, %v3370_v53  ;;  %v2134_v39 = vmul.f32 %v1769_v23, %v1769_v23  ;;  %v3377_v37 = vld [vmem:[#allocation13_spill] sm:$0xff]  ;;  %v3378_v23 = vld [vmem:[#allocation14_spill] sm:$0xff] }
 0x1a7   :  { %3357 = vst [vmem:[#allocation140_spill] sm:$0xff] %v2086_v61  ;;  %3359 = vst [vmem:[#allocation141_spill] sm:$0xff] %v2090_v8  ;;  %v2138_v30 = vmul.f32 %v1772_v41, %v1772_v41  ;;  %v2142_v4 = vmul.f32 %v1775_v26, %v1775_v26  ;;  %v2146_v40 = vmul.f32 %v1778_v36, %v1778_v36  ;;  %v3381_v62 = vld [vmem:[#allocation19_spill] sm:$0xff]  ;;  %v3398_v58 = vld [vmem:[#allocation44_spill] sm:$0xff] }
 0x1a8   :  { %3361 = vst [vmem:[#allocation142_spill] sm:$0xff] %v2094_v57  ;;  %3363 = vst [vmem:[#allocation143_spill] sm:$0xff] %v2098_v18  ;;  %v387_v9 = vmul.f32 %v323_v3, %v323_v3  ;;  %v389_v60 = vmul.f32 %v325_v17, %v325_v17  ;;  %v530_v0 = vsub.f32 %v3377_v37, %v2118_v13  ;;  %v3400_v48 = vld [vmem:[#allocation48_spill] sm:$0xff]  ;;  %v3402_v45 = vld [vmem:[#allocation49_spill] sm:$0xff] }
 0x1a9   :  { %3365 = vst [vmem:[#allocation144_spill] sm:$0xff] %v2102_v54  ;;  %3367 = vst [vmem:[#allocation145_spill] sm:$0xff] %v2106_v63  ;;  %v532_v56 = vsub.f32 %v3378_v23, %v2118_v13  ;;  %v2154_v41 = vmul.f32 %v1781_v42, %v1781_v42  ;;  %v2158_v26 = vmul.f32 %v1784_v6, %v1784_v6  ;;  %v3404_v28 = vld [vmem:[#allocation54_spill] sm:$0xff] }
 0x1aa   :  { %3369 = vst [vmem:[#allocation146_spill] sm:$0xff] %v2110_v24  ;;  %v593_v36 = vmul.f32 %v1858_v47, %v1858_v47  ;;  %v595_v55 = vmul.f32 %v1862_v25, %v1862_v25  ;;  %v2166_v37 = vmul.f32 %v1787_v7, %v1787_v7  ;;  %v2170_v23 = vmul.f32 %v1790_v19, %v1790_v19  ;;  %v3379_v25 = vld [vmem:[#allocation17_spill] sm:$0xff]  ;;  %v3380_v7 = vld [vmem:[#allocation18_spill] sm:$0xff] }
 0x1ab   :  { %v391_v42 = vmul.f32 %v2126_v51, %v2126_v51  ;;  %v393_v6 = vmul.f32 %v2130_v52, %v2130_v52  ;;  %v2178_v47 = vmul.f32 %v1793_v20, %v1793_v20  ;;  %v2182_v44 = vsub.f32 %v3379_v25, %v2118_v13 }
 0x1ac   :  { %v2186_v24 = vsub.f32 %v3380_v7, %v2118_v13  ;;  %v1044_v19 = vpack.c.bf16 %v388_v1, %v386_v59  ;;  %v1042_v63 = vpack.c.bf16 %v389_v60, %v387_v9  ;;  %v594_v54 = vmul.f32 %v530_v0, %v530_v0  ;;  %v3382_v59 = vld [vmem:[#allocation20_spill] sm:$0xff]  ;;  %v3385_v9 = vld [vmem:[#allocation23_spill] sm:$0xff] }
 0x1ad   :  { %v596_v18 = vmul.f32 %v532_v56, %v532_v56  ;;  %v2188_v57 = vmul.f32 %v530_v0, %v323_v3  ;;  %v2190_v8 = vmul.f32 %v532_v56, %v325_v17  ;;  %v1108_v61 = vpack.c.bf16 %v595_v55, %v593_v36  ;;  %v3389_v36 = vld [vmem:[#allocation27_spill] sm:$0xff] }
 0x1ae   :  { %v598_v20 = vmul.f32 %v2182_v44, %v2182_v44  ;;  %v600_v25 = vmul.f32 %v2186_v24, %v2186_v24  ;;  %v2198_v27 = vsub.f32 %v3381_v62, %v3370_v53  ;;  %v2202_v1 = vsub.f32 %v3382_v59, %v3370_v53  ;;  %1043 = vmatprep.subr.bf16.mxu0 %v1042_v63 }
 0x1af   :  { %v1106_v0 = vpack.c.bf16 %v596_v18, %v594_v54  ;;  %v1046_v3 = vpack.c.bf16 %v393_v6, %v391_v42  ;;  %v2206_v55 = vmul.f32 %v1796_v31, %v1796_v31  ;;  %v2210_v56 = vmul.f32 %v1799_v32, %v1799_v32  ;;  %1045 = vmatpush1.bf16.xpose.msra.mxu0 %v1044_v19  ;;  %v3386_v18 = vld [vmem:[#allocation21_spill] sm:$0xff]  ;;  %v3387_v31 = vld [vmem:[#allocation22_spill] sm:$0xff]  ;;  %v3388_v32 = vld [vmem:[#allocation24_spill] sm:$0xff] }
 0x1b0   :  { %v2214_v17 = vmul.f32 %v1802_v43, %v1802_v43  ;;  %v1110_v62 = vpack.c.bf16 %v600_v25, %v598_v20  ;;  %v2218_v60 = vsub.f32 %v3385_v9, %v3370_v53  ;;  %v2222_v54 = vsub.f32 %v3386_v18, %v2118_v13  ;;  %v3393_v9 = vld [vmem:[#allocation35_spill] sm:$0xff] }
 0x1b1   :  { %3383 = vst [vmem:[#allocation92_spill] sm:$0xff] %v2210_v56  ;;  %v2226_v63 = vsub.f32 %v3387_v31, %v2118_v13  ;;  %1107 = vmatprep.subr.bf16.mxu1 %v1106_v0  ;;  %1047 = vmatprep.subr.bf16.mxu0 %v1046_v3  ;;  %v2230_v43 = vsub.f32 %v3388_v32, %v3370_v53  ;;  %v3390_v0 = vld [vmem:[#allocation28_spill] sm:$0xff]  ;;  %v3397_v56 = vld [vmem:[#allocation43_spill] sm:$0xff] }
 0x1b2   :  { %3384 = vst [vmem:[#allocation11_spill] sm:$0xff] %v2214_v17  ;;  %v2234_v42 = vsub.f32 %v3389_v36, %v3370_v53  ;;  %v597_v6 = vmul.f32 %v1866_v35, %v1866_v35  ;;  %v599_v7 = vmul.f32 %v1870_v15, %v1870_v15  ;;  %1109 = vmatpush1.bf16.xpose.msra.mxu1 %v1108_v61  ;;  %v3391_v15 = vld [vmem:[#allocation31_spill] sm:$0xff]  ;;  %v3392_v3 = vld [vmem:[#allocation32_spill] sm:$0xff] }
 0x1b3   :  { %1111 = vmatprep.subr.bf16.mxu1 %v1110_v62  ;;  %v395_v19 = vmul.f32 %v2198_v27, %v2198_v27  ;;  %v397_v20 = vmul.f32 %v2202_v1, %v2202_v1  ;;  %v602_v25 = vmul.f32 %v2222_v54, %v2222_v54  ;;  %v604_v59 = vmul.f32 %v2226_v63, %v2226_v63  ;;  %v3394_v31 = vld [vmem:[#allocation36_spill] sm:$0xff]  ;;  %v3395_v36 = vld [vmem:[#allocation39_spill] sm:$0xff] }
 0x1b4   :  { %v2250_v35 = vsub.f32 %v3390_v0, %v3370_v53  ;;  %v2254_v61 = vsub.f32 %v3391_v15, %v3370_v53  ;;  %v2258_v62 = vsub.f32 %v3392_v3, %v3370_v53  ;;  %v2262_v18 = vsub.f32 %v3393_v9, %v3370_v53  ;;  %v3396_v17 = vld [vmem:[#allocation40_spill] sm:$0xff] }
 0x1b5   :  { %v2266_v32 = vsub.f32 %v3394_v31, %v3370_v53  ;;  %v2270_v0 = vsub.f32 %v3395_v36, %v3370_v53  ;;  %v2274_v15 = vsub.f32 %v3396_v17, %v3370_v53  ;;  %v2278_v3 = vsub.f32 %v3397_v56, %v3370_v53 }
 0x1b6   :  { %v2282_v9 = vsub.f32 %v3398_v58, %v3370_v53  ;;  %v2286_v31 = vsub.f32 %v3400_v48, %v3370_v53  ;;  %v1048_v36 = vpack.c.bf16 %v2138_v30, %v2134_v39  ;;  %v1112_v46 = vpack.c.bf16 %v599_v7, %v597_v6  ;;  %v3406_v58 = vld [vmem:[#allocation55_spill] sm:$0xff]  ;;  %v3408_v48 = vld [vmem:[#allocation60_spill] sm:$0xff]  ;;  %v3410_v39 = vld [vmem:[#allocation61_spill] sm:$0xff] }
 0x1b7   :  { %v2292_v17 = vsub.f32 %v3402_v45, %v3370_v53  ;;  %v2296_v56 = vsub.f32 %v3404_v28, %v3370_v53  ;;  %v1050_v38 = vpack.c.bf16 %v397_v20, %v395_v19  ;;  %v1114_v5 = vpack.c.bf16 %v604_v59, %v602_v25  ;;  %v3412_v45 = vld [vmem:[#allocation66_spill] sm:$0xff]  ;;  %v3414_v28 = vld [vmem:[#allocation67_spill] sm:$0xff]  ;;  %v3416_v19 = vld [vmem:[#allocation72_spill] sm:$0xff] }
 0x1b8   :  { %3399 = vst [vmem:[#allocation12_spill] sm:$0xff] %v2282_v9  ;;  %3401 = vst [vmem:[#allocation91_spill] sm:$0xff] %v2286_v31  ;;  %v2300_v9 = vsub.f32 %v3406_v58, %v3370_v53  ;;  %v2304_v31 = vsub.f32 %v3408_v48, %v3370_v53  ;;  %v2308_v30 = vsub.f32 %v3410_v39, %v3370_v53  ;;  %1049 = vmatpush1.bf16.xpose.msra.mxu0 %v1048_v36  ;;  %v3418_v25 = vld [vmem:[#allocation25_spill] sm:$0xff]  ;;  %v3419_v58 = vld [vmem:[#allocation26_spill] sm:$0xff] }
 0x1b9   :  { %3403 = vst [vmem:[#allocation93_spill] sm:$0xff] %v2292_v17  ;;  %3405 = vst [vmem:[#allocation15_spill] sm:$0xff] %v2296_v56  ;;  %v2312_v6 = vsub.f32 %v3412_v45, %v3370_v53  ;;  %v2316_v7 = vsub.f32 %v3414_v28, %v3370_v53  ;;  %v2320_v20 = vsub.f32 %v3416_v19, %v3370_v53  ;;  %1051 = vmatprep.subr.bf16.mxu0 %v1050_v38  ;;  %v3420_v39 = vld [vmem:[#allocation73_spill] sm:$0xff]  ;;  %v3422_v45 = vld [vmem:[#allocation78_spill] sm:$0xff] }
 0x1ba   :  { %3407 = vst [vmem:[#allocation16_spill] sm:$0xff] %v2300_v9  ;;  %3409 = vst [vmem:[#allocation13_spill] sm:$0xff] %v2304_v31  ;;  %v2324_v59 = vsub.f32 %v3418_v25, %v2118_v13  ;;  %v2328_v48 = vsub.f32 %v3419_v58, %v2118_v13  ;;  %v2332_v36 = vsub.f32 %v3420_v39, %v3370_v53  ;;  %1113 = vmatpush1.bf16.xpose.msra.mxu1 %v1112_v46  ;;  %v3449_v9 = vld [vmem:[#allocation57_spill] sm:$0xff] }
 0x1bb   :  { %3411 = vst [vmem:[#allocation14_spill] sm:$0xff] %v2308_v30  ;;  %3413 = vst [vmem:[#allocation17_spill] sm:$0xff] %v2312_v6  ;;  %v2336_v28 = vsub.f32 %v3422_v45, %v3370_v53  ;;  %v601_v19 = vmul.f32 %v1874_v2, %v1874_v2  ;;  %v603_v25 = vmul.f32 %v1878_v10, %v1878_v10  ;;  %1115 = vmatprep.subr.bf16.mxu1 %v1114_v5  ;;  %v3426_v10 = vld [vmem:[#allocation84_spill] sm:$0xff]  ;;  %v3428_v5 = vld [vmem:[#allocation85_spill] sm:$0xff] }
 0x1bc   :  { %3415 = vst [vmem:[#allocation18_spill] sm:$0xff] %v2316_v7  ;;  %3417 = vst [vmem:[#allocation19_spill] sm:$0xff] %v2320_v20  ;;  %v399_v58 = vmul.f32 %v2218_v60, %v2218_v60  ;;  %v401_v38 = vmul.f32 %v2230_v43, %v2230_v43  ;;  %v606_v39 = vmul.f32 %v2324_v59, %v2324_v59  ;;  %v3447_v30 = vld [vmem:[#allocation56_spill] sm:$0xff] }
 0x1bd   :  { %3421 = vst [vmem:[#allocation20_spill] sm:$0xff] %v2332_v36  ;;  %3423 = vst [vmem:[#allocation23_spill] sm:$0xff] %v2336_v28  ;;  %v608_v45 = vmul.f32 %v2328_v48, %v2328_v48  ;;  %v3424_v28 = vld [vmem:[#allocation79_spill] sm:$0xff]  ;;  %v2356_v46 = vsub.f32 %v3426_v10, %v3370_v53  ;;  %v2360_v36 = vsub.f32 %v3428_v5, %v3370_v53  ;;  %v3432_v5 = vld [vmem:[#allocation29_spill] sm:$0xff] }
 0x1be   :  { %v2352_v2 = vsub.f32 %v3424_v28, %v3370_v53  ;;  %v605_v20 = vmul.f32 %v1882_v11, %v1882_v11  ;;  %v607_v7 = vmul.f32 %v1886_v12, %v1886_v12  ;;  %v2368_v6 = vmul.f32 %v1890_v14, %v1890_v14 }
 0x1bf   :  { %3427 = vst [vmem:[#allocation22_spill] sm:$0xff] %v2356_v46  ;;  %3429 = vst [vmem:[#allocation24_spill] sm:$0xff] %v2360_v36  ;;  %v2372_v28 = vmul.f32 %v1894_v16, %v1894_v16  ;;  %v2376_v10 = vmul.f32 %v1898_v21, %v1898_v21  ;;  %v2380_v53 = vmul.f32 %v1902_v22, %v1902_v22  ;;  %v3433_v22 = vld [vmem:[#allocation30_spill] sm:$0xff] }
 0x1c0   :  { %3425 = vst [vmem:[#allocation21_spill] sm:$0xff] %v2352_v2  ;;  %v2384_v11 = vmul.f32 %v1906_v33, %v1906_v33  ;;  %v1052_v12 = vpack.c.bf16 %v2146_v40, %v2142_v4  ;;  %v1116_v14 = vpack.c.bf16 %v603_v25, %v601_v19  ;;  %v2390_v16 = vmul.f32 %v1910_v34, %v1910_v34  ;;  %v3434_v33 = vld [vmem:[#allocation33_spill] sm:$0xff]  ;;  %v3435_v4 = vld [vmem:[#allocation34_spill] sm:$0xff]  ;;  %v3506_v49 = vld [vmem:[#allocation15_spill] sm:$0xff] }
 0x1c1   :  { %v2394_v21 = vsub.f32 %v3432_v5, %v2118_v13  ;;  %v1054_v36 = vpack.c.bf16 %v401_v38, %v399_v58  ;;  %v1118_v46 = vpack.c.bf16 %v608_v45, %v606_v39  ;;  %v2398_v2 = vsub.f32 %v3433_v22, %v2118_v13  ;;  %v3436_v34 = vld [vmem:[#allocation37_spill] sm:$0xff]  ;;  %v3437_v25 = vld [vmem:[#allocation38_spill] sm:$0xff] }
 0x1c2   :  { %3430 = vst [vmem:[#allocation27_spill] sm:$0xff] %v2384_v11  ;;  %3431 = vst [vmem:[#allocation28_spill] sm:$0xff] %v2390_v16  ;;  %v2402_v11 = vsub.f32 %v3434_v33, %v2118_v13  ;;  %v2406_v40 = vsub.f32 %v3435_v4, %v2118_v13  ;;  %v2410_v19 = vsub.f32 %v3436_v34, %v2118_v13  ;;  %1053 = vmatpush1.bf16.xpose.msra.mxu0 %v1052_v12  ;;  %v3438_v38 = vld [vmem:[#allocation41_spill] sm:$0xff]  ;;  %v3439_v45 = vld [vmem:[#allocation42_spill] sm:$0xff] }
 0x1c3   :  { %v2414_v58 = vsub.f32 %v3437_v25, %v2118_v13  ;;  %v2418_v39 = vsub.f32 %v3438_v38, %v2118_v13  ;;  %v2422_v5 = vsub.f32 %v3439_v45, %v2118_v13  ;;  %v3440_v22 = vld [vmem:[#allocation45_spill] sm:$0xff]  ;;  %1055 = vmatprep.subr.bf16.mxu0 %v1054_v36  ;;  %1117 = vmatpush1.bf16.xpose.msra.mxu1 %v1116_v14  ;;  %v3441_v38 = vld [vmem:[#allocation46_spill] sm:$0xff]  ;;  %v3445_v14 = vld [vmem:[#allocation51_spill] sm:$0xff] }
 0x1c4   :  { %v2426_v33 = vsub.f32 %v3440_v22, %v2118_v13  ;;  %v403_v12 = vmul.f32 %v2234_v42, %v2234_v42  ;;  %v405_v4 = vmul.f32 %v2250_v35, %v2250_v35  ;;  %v610_v34 = vmul.f32 %v2394_v21, %v2394_v21  ;;  %v3443_v22 = vld [vmem:[#allocation50_spill] sm:$0xff]  ;;  %1119 = vmatprep.subr.bf16.mxu1 %v1118_v46 }
 0x1c5   :  { %v612_v25 = vmul.f32 %v2398_v2, %v2398_v2  ;;  %v2438_v45 = vsub.f32 %v3441_v38, %v2118_v13  ;;  %v2442_v36 = vsub.f32 %v3443_v22, %v2118_v13  ;;  %v2446_v16 = vsub.f32 %v3445_v14, %v2118_v13  ;;  %v3451_v38 = vld [vmem:[#allocation62_spill] sm:$0xff]  ;;  %v3453_v22 = vld [vmem:[#allocation63_spill] sm:$0xff]  ;;  %v3455_v14 = vld [vmem:[#allocation68_spill] sm:$0xff] }
 0x1c6   :  { %v2450_v31 = vsub.f32 %v3447_v30, %v2118_v13  ;;  %v2454_v56 = vsub.f32 %v3449_v9, %v2118_v13  ;;  %v2458_v17 = vsub.f32 %v3451_v38, %v2118_v13  ;;  %v3457_v30 = vld [vmem:[#allocation69_spill] sm:$0xff]  ;;  %v3459_v46 = vld [vmem:[#allocation74_spill] sm:$0xff]  ;;  %v1056_v38 = vpack.c.bf16 %v2158_v26, %v2154_v41  ;;  %v3461_v26 = vld [vmem:[#allocation75_spill] sm:$0xff] }
 0x1c7   :  { %3442 = vst [vmem:[#allocation31_spill] sm:$0xff] %v2438_v45  ;;  %3444 = vst [vmem:[#allocation32_spill] sm:$0xff] %v2442_v36  ;;  %v2462_v36 = vsub.f32 %v3453_v22, %v2118_v13  ;;  %v2474_v9 = vsub.f32 %v3459_v46, %v2118_v13  ;;  %v1122_v45 = vpack.c.bf16 %v612_v25, %v610_v34  ;;  %v3465_v25 = vld [vmem:[#allocation81_spill] sm:$0xff] }
 0x1c8   :  { %3446 = vst [vmem:[#allocation35_spill] sm:$0xff] %v2446_v16  ;;  %3448 = vst [vmem:[#allocation36_spill] sm:$0xff] %v2450_v31  ;;  %v2466_v16 = vsub.f32 %v3455_v14, %v2118_v13  ;;  %v2470_v31 = vsub.f32 %v3457_v30, %v2118_v13  ;;  %v407_v22 = vmul.f32 %v2254_v61, %v2254_v61 }
 0x1c9   :  { %3450 = vst [vmem:[#allocation39_spill] sm:$0xff] %v2454_v56  ;;  %3452 = vst [vmem:[#allocation40_spill] sm:$0xff] %v2458_v17  ;;  %v1120_v17 = vpack.c.bf16 %v607_v7, %v605_v20  ;;  %v1058_v56 = vpack.c.bf16 %v405_v4, %v403_v12  ;;  %v409_v14 = vmul.f32 %v2258_v62, %v2258_v62  ;;  %v3463_v20 = vld [vmem:[#allocation80_spill] sm:$0xff] }
 0x1ca   :  { %3454 = vst [vmem:[#allocation43_spill] sm:$0xff] %v2462_v36  ;;  %3456 = vst [vmem:[#allocation44_spill] sm:$0xff] %v2466_v16  ;;  %v614_v30 = vmul.f32 %v2402_v11, %v2402_v11  ;;  %v2488_v46 = vmul.f32 %v2262_v18, %v2262_v18  ;;  %v2492_v41 = vmul.f32 %v2266_v32, %v2266_v32  ;;  %1057 = vmatpush1.bf16.xpose.msra.mxu0 %v1056_v38 }
 0x1cb   :  { %3458 = vst [vmem:[#allocation48_spill] sm:$0xff] %v2470_v31  ;;  %3460 = vst [vmem:[#allocation49_spill] sm:$0xff] %v2474_v9  ;;  %v616_v31 = vmul.f32 %v2406_v40, %v2406_v40  ;;  %v2496_v7 = vsub.f32 %v3461_v26, %v2118_v13  ;;  %v2500_v12 = vsub.f32 %v3463_v20, %v2118_v13  ;;  %v3466_v26 = vld [vmem:[#allocation86_spill] sm:$0xff]  ;;  %v3468_v20 = vld [vmem:[#allocation87_spill] sm:$0xff]  ;;  %1059 = vmatprep.subr.bf16.mxu0 %v1058_v56 }
 0x1cc   :  { %v2504_v4 = vmul.f32 %v2410_v19, %v2410_v19  ;;  %v2508_v34 = vmul.f32 %v2414_v58, %v2414_v58  ;;  %v2512_v9 = vsub.f32 %v3465_v25, %v2118_v13  ;;  %v1060_v38 = vpack.c.bf16 %v2170_v23, %v2166_v37  ;;  %1121 = vmatpush1.bf16.xpose.msra.mxu1 %v1120_v17  ;;  %v3469_v37 = vld [vmem:[#allocation115_spill] sm:$0xff]  ;;  %v3470_v23 = vld [vmem:[#allocation116_spill] sm:$0xff]  ;;  %v3517_v17 = vld [vmem:[#allocation14_spill] sm:$0xff] }
 0x1cd   :  { %3462 = vst [vmem:[#allocation54_spill] sm:$0xff] %v2496_v7  ;;  %3464 = vst [vmem:[#allocation55_spill] sm:$0xff] %v2500_v12  ;;  %v2516_v7 = vsub.f32 %v3466_v26, %v2118_v13  ;;  %v2520_v12 = vsub.f32 %v3468_v20, %v2118_v13  ;;  %v1124_v16 = vpack.c.bf16 %v2372_v28, %v2368_v6  ;;  %1123 = vmatprep.subr.bf16.mxu1 %v1122_v45  ;;  %v3471_v28 = vld [vmem:[#allocation117_spill] sm:$0xff]  ;;  %v3472_v45 = vld [vmem:[#allocation118_spill] sm:$0xff] }
 0x1ce   :  { %v1062_v36 = vpack.c.bf16 %v409_v14, %v407_v22  ;;  %v1064_v25 = vpack.c.bf16 %v2206_v55, %v2178_v47  ;;  %v1066_v13 = vpack.c.bf16 %v2492_v41, %v2488_v46  ;;  %v2540_v47 = vmul.f32 %v2270_v0, %v2270_v0  ;;  %v3551_v41 = vld [vmem:[#allocation92_spill] sm:$0xff] }
 0x1cf   :  { %3467 = vst [vmem:[#allocation60_spill] sm:$0xff] %v2516_v7  ;;  %v1126_v7 = vpack.c.bf16 %v616_v31, %v614_v30  ;;  %v2544_v55 = vmul.f32 %v2182_v44, %v2126_v51  ;;  %v2548_v31 = vmul.f32 %v2186_v24, %v2130_v52  ;;  %v2554_v14 = vmul.f32 %v2222_v54, %v2198_v27  ;;  %v3507_v50 = vld [vmem:[#allocation36_spill] sm:$0xff]  ;;  %v3544_v27 = vld [vmem:[#allocation22_spill] sm:$0xff] }
 0x1d0   :  { %v2558_v30 = vmul.f32 %v2226_v63, %v2202_v1  ;;  %v2566_v24 = vmul.f32 %v2324_v59, %v2218_v60  ;;  %v2570_v51 = vmul.f32 %v2328_v48, %v2230_v43  ;;  %v2578_v63 = vmul.f32 %v2394_v21, %v2234_v42  ;;  %v3501_v43 = vld [vmem:[#allocation93_spill] sm:$0xff]  ;;  %v3510_v22 = vld [vmem:[#allocation39_spill] sm:$0xff]  ;;  %v3533_v21 = vld [vmem:[#allocation20_spill] sm:$0xff] }
 0x1d1   :  { %v2582_v20 = vmul.f32 %v2398_v2, %v2250_v35  ;;  %v2590_v48 = vmul.f32 %v2402_v11, %v2254_v61  ;;  %v2594_v54 = vmul.f32 %v2406_v40, %v2258_v62  ;;  %v2602_v2 = vmul.f32 %v2410_v19, %v2262_v18  ;;  %v3493_v19 = vld [vmem:[#allocation12_spill] sm:$0xff]  ;;  %v3498_v35 = vld [vmem:[#allocation91_spill] sm:$0xff]  ;;  %v3540_v59 = vld [vmem:[#allocation21_spill] sm:$0xff] }
 0x1d2   :  { %3475 = vst [vmem:[#allocation61_spill] sm:$0xff] %v2566_v24  ;;  %3476 = vst [vmem:[#allocation66_spill] sm:$0xff] %v2570_v51  ;;  %1061 = vmatpush1.bf16.xpose.msra.mxu0 %v1060_v38  ;;  %v2606_v38 = vmul.f32 %v2414_v58, %v2266_v32  ;;  %v2614_v40 = vmul.f32 %v2418_v39, %v2270_v0  ;;  %v3494_v58 = vld [vmem:[#allocation31_spill] sm:$0xff]  ;;  %v3499_v18 = vld [vmem:[#allocation32_spill] sm:$0xff]  ;;  %v2650_v62 = vmul.f32 %v3507_v50, %v3506_v49 }
 0x1d3   :  { %3479 = vst [vmem:[#allocation67_spill] sm:$0xff] %v2578_v63  ;;  %3480 = vst [vmem:[#allocation72_spill] sm:$0xff] %v2582_v20  ;;  %1063 = vmatprep.subr.bf16.mxu0 %v1062_v36  ;;  %v2618_v36 = vmul.f32 %v2422_v5, %v2274_v15  ;;  %v2630_v11 = vmul.f32 %v3494_v58, %v3493_v19  ;;  %v3502_v32 = vld [vmem:[#allocation35_spill] sm:$0xff]  ;;  %v3509_v0 = vld [vmem:[#allocation16_spill] sm:$0xff]  ;;  %v3543_v51 = vpack.c.bf16 %v2380_v53, %v2376_v10 }
 0x1d4   :  { %3483 = vst [vmem:[#allocation25_spill] sm:$0xff] %v2590_v48  ;;  %3484 = vst [vmem:[#allocation26_spill] sm:$0xff] %v2594_v54  ;;  %1125 = vmatpush1.bf16.xpose.msra.mxu1 %v1124_v16  ;;  %v2626_v16 = vmul.f32 %v2426_v33, %v2278_v3  ;;  %v2642_v44 = vmul.f32 %v3502_v32, %v3501_v43  ;;  %v2654_v1 = vmul.f32 %v3510_v22, %v3509_v0  ;;  %v3518_v26 = vld [vmem:[#allocation43_spill] sm:$0xff]  ;;  %v3522_v48 = vld [vmem:[#allocation17_spill] sm:$0xff] }
 0x1d5   :  { %3487 = vst [vmem:[#allocation73_spill] sm:$0xff] %v2602_v2  ;;  %3488 = vst [vmem:[#allocation78_spill] sm:$0xff] %v2606_v38  ;;  %1127 = vmatprep.subr.bf16.mxu1 %v1126_v7  ;;  %v2638_v7 = vmul.f32 %v3499_v18, %v3498_v35  ;;  %v3514_v2 = vld [vmem:[#allocation13_spill] sm:$0xff]  ;;  %v3515_v38 = vld [vmem:[#allocation40_spill] sm:$0xff]  ;;  %v2666_v56 = vmul.f32 %v3518_v26, %v3517_v17  ;;  %v3550_v24 = vpack.c.bf16 %v2508_v34, %v2504_v4 }
 0x1d6   :  { %3490 = vst [vmem:[#allocation79_spill] sm:$0xff] %v2614_v40  ;;  %3491 = vst [vmem:[#allocation84_spill] sm:$0xff] %v2618_v36  ;;  %v2662_v6 = vmul.f32 %v3515_v38, %v3514_v2  ;;  %v3523_v54 = vld [vmem:[#allocation44_spill] sm:$0xff]  ;;  %v3525_v40 = vld [vmem:[#allocation18_spill] sm:$0xff]  ;;  %v417_v10 = vmul.f32 %v2274_v15, %v2274_v15  ;;  %v622_v53 = vmul.f32 %v2418_v39, %v2418_v39 }
 0x1d7   :  { %3492 = vst [vmem:[#allocation85_spill] sm:$0xff] %v2626_v16  ;;  %3495 = vst [vmem:[#allocation29_spill] sm:$0xff] %v2630_v11  ;;  %v2674_v61 = vmul.f32 %v3523_v54, %v3522_v48  ;;  %v3526_v29 = vld [vmem:[#allocation48_spill] sm:$0xff]  ;;  %v3530_v63 = vld [vmem:[#allocation19_spill] sm:$0xff] }
 0x1d8   :  { %3500 = vst [vmem:[#allocation30_spill] sm:$0xff] %v2638_v7  ;;  %3503 = vst [vmem:[#allocation33_spill] sm:$0xff] %v2642_v44  ;;  %v2678_v36 = vmul.f32 %v3526_v29, %v3525_v40  ;;  %v3531_v42 = vld [vmem:[#allocation49_spill] sm:$0xff]  ;;  %v3534_v11 = vld [vmem:[#allocation54_spill] sm:$0xff]  ;;  %v2702_v44 = vmul.f32 %v2512_v9, %v3540_v59  ;;  %v1070_v15 = vpack.c.bf16 %v417_v10, %v2540_v47 }
 0x1d9   :  { %3508 = vst [vmem:[#allocation34_spill] sm:$0xff] %v2650_v62  ;;  %3511 = vst [vmem:[#allocation37_spill] sm:$0xff] %v2654_v1  ;;  %v2686_v16 = vmul.f32 %v3531_v42, %v3530_v63  ;;  %v2690_v62 = vmul.f32 %v3534_v11, %v3533_v21  ;;  %v3537_v60 = vld [vmem:[#allocation23_spill] sm:$0xff]  ;;  %v3545_v52 = vld [vmem:[#allocation60_spill] sm:$0xff]  ;;  %v419_v47 = vmul.f32 %v2278_v3, %v2278_v3 }
 0x1da   :  { %3516 = vst [vmem:[#allocation38_spill] sm:$0xff] %v2662_v6  ;;  %3519 = vst [vmem:[#allocation41_spill] sm:$0xff] %v2666_v56  ;;  %1065 = vmatpush1.bf16.xpose.msra.mxu0 %v1064_v25  ;;  %v3538_v25 = vld [vmem:[#allocation55_spill] sm:$0xff]  ;;  %v2713_v1 = vmul.f32 %v3545_v52, %v3544_v27  ;;  %v3547_v20 = vld [vmem:[#allocation24_spill] sm:$0xff] }
 0x1db   :  { %3524 = vst [vmem:[#allocation42_spill] sm:$0xff] %v2674_v61  ;;  %3527 = vst [vmem:[#allocation45_spill] sm:$0xff] %v2678_v36  ;;  %1067 = vmatprep.subr.bf16.mxu0 %v1066_v13  ;;  %v2698_v7 = vmul.f32 %v3538_v25, %v3537_v60  ;;  %v2717_v61 = vmul.f32 %v2520_v12, %v3547_v20  ;;  %v3552_v36 = vld [vmem:[#allocation11_spill] sm:$0xff]  ;;  %v3554_v34 = vld [vmem:[#allocation28_spill] sm:$0xff] }
 0x1dc   :  { %3532 = vst [vmem:[#allocation46_spill] sm:$0xff] %v2686_v16  ;;  %1129 = vmatpush1.bf16.xpose.msra.mxu1 %v3543_v51  ;;  %3546 = vst [vmem:[#allocation51_spill] sm:$0xff] %v2713_v1  ;;  %v624_v51 = vmul.f32 %v2422_v5, %v2422_v5  ;;  %v1068_v46 = vpack.c.bf16 %v3552_v36, %v3551_v41  ;;  %v3553_v4 = vld [vmem:[#allocation27_spill] sm:$0xff]  ;;  %v3555_v39 = vld [vmem:[#allocation94_spill] sm:$0xff]  ;;  %v626_v36 = vmul.f32 %v2426_v33, %v2426_v33 }
 0x1dd   :  { %3539 = vst [vmem:[#allocation50_spill] sm:$0xff] %v2698_v7  ;;  %1131 = vmatprep.subr.bf16.mxu1 %v3550_v24  ;;  %v1132_v24 = vpack.c.bf16 %v3554_v34, %v3553_v4  ;;  %v414_v5 = vmul.f32 %v3555_v39, %v3555_v39  ;;  %v3556_v16 = vld [vmem:[#allocation95_spill] sm:$0xff]  ;;  %v3557_v7 = vld [vmem:[#allocation112_spill] sm:$0xff]  ;;  %v3558_v1 = vld [vmem:[#allocation113_spill] sm:$0xff] }
 0x1de   :  { %v1134_v56 = vpack.c.bf16 %v624_v51, %v622_v53  ;;  %v416_v13 = vmul.f32 %v3556_v16, %v3556_v16  ;;  %v621_v6 = vmul.f32 %v3557_v7, %v3557_v7  ;;  %v623_v41 = vmul.f32 %v3558_v1, %v3558_v1  ;;  %v3559_v1 = vld [vmem:[#allocation96_spill] sm:$0xff]  ;;  %v3560_v4 = vld [vmem:[#allocation97_spill] sm:$0xff]  ;;  %v3561_v34 = vld [vmem:[#allocation114_spill] sm:$0xff] }
 0x1df   :  { %v628_v16 = vmul.f32 %v3494_v58, %v3494_v58  ;;  %v420_v3 = vmul.f32 %v3560_v4, %v3560_v4  ;;  %v425_v58 = vmul.f32 %v3501_v43, %v3501_v43 }
 0x1e0   :  { %v1072_v10 = vpack.c.bf16 %v416_v13, %v414_v5  ;;  %v1136_v53 = vpack.c.bf16 %v623_v41, %v621_v6  ;;  %v423_v6 = vmul.f32 %v3498_v35, %v3498_v35  ;;  %v630_v13 = vmul.f32 %v3499_v18, %v3499_v18 }
 0x1e1   :  { %v1138_v51 = vpack.c.bf16 %v628_v16, %v626_v36  ;;  %v3564_v16 = vld [vmem:[#allocation99_spill] sm:$0xff] }
 0x1e2   :  { %1069 = vmatpush1.bf16.xpose.msra.mxu0 %v1068_v46  ;;  %v421_v46 = vmul.f32 %v3493_v19, %v3493_v19  ;;  %v625_v19 = vmul.f32 %v3561_v34, %v3561_v34  ;;  %v1078_v41 = vpack.c.bf16 %v425_v58, %v423_v6  ;;  %v424_v35 = vmul.f32 %v3564_v16, %v3564_v16  ;;  %v3569_v6 = vld [vmem:[#allocation58_spill] sm:$0xff]  ;;  %v3570_v58 = vld [vmem:[#allocation59_spill] sm:$0xff] }
 0x1e3   :  { %1071 = vmatprep.subr.bf16.mxu0 %v1070_v15  ;;  %v632_v15 = vmul.f32 %v3502_v32, %v3502_v32  ;;  %v427_v32 = vmul.f32 %v3506_v49, %v3506_v49 }
 0x1e4   :  { %1133 = vmatpush1.bf16.xpose.msra.mxu1 %v1132_v24  ;;  %v1074_v7 = vpack.c.bf16 %v421_v46, %v419_v47  ;;  %v3562_v24 = vld [vmem:[#allocation47_spill] sm:$0xff]  ;;  %v3563_v46 = vld [vmem:[#allocation98_spill] sm:$0xff] }
 0x1e5   :  { %1135 = vmatprep.subr.bf16.mxu1 %v1134_v56  ;;  %v418_v56 = vmul.f32 %v3559_v1, %v3559_v1  ;;  %v627_v33 = vmul.f32 %v3562_v24, %v3562_v24  ;;  %v1142_v47 = vpack.c.bf16 %v632_v15, %v630_v13  ;;  %v422_v36 = vmul.f32 %v3563_v46, %v3563_v46 }
 0x1e6   :  { %v636_v1 = vmul.f32 %v3510_v22, %v3510_v22  ;;  %v431_v22 = vmul.f32 %v3514_v2, %v3514_v2  ;;  %v433_v13 = vmul.f32 %v3517_v17, %v3517_v17  ;;  %v638_v15 = vmul.f32 %v3515_v38, %v3515_v38 }
 0x1e7   :  { %v1076_v39 = vpack.c.bf16 %v420_v3, %v418_v56  ;;  %v1140_v5 = vpack.c.bf16 %v627_v33, %v625_v19  ;;  %v1080_v56 = vpack.c.bf16 %v424_v35, %v422_v36  ;;  %v3567_v19 = vld [vmem:[#allocation100_spill] sm:$0xff]  ;;  %v3568_v33 = vld [vmem:[#allocation101_spill] sm:$0xff]  ;;  %v3571_v36 = vld [vmem:[#allocation102_spill] sm:$0xff] }
 0x1e8   :  { %v426_v24 = vmul.f32 %v3567_v19, %v3567_v19  ;;  %v428_v49 = vmul.f32 %v3568_v33, %v3568_v33  ;;  %v430_v16 = vmul.f32 %v3571_v36, %v3571_v36  ;;  %v3572_v35 = vld [vmem:[#allocation103_spill] sm:$0xff]  ;;  %v3577_v19 = vld [vmem:[#allocation70_spill] sm:$0xff]  ;;  %v441_v33 = vmul.f32 %v3533_v21, %v3533_v21 }
 0x1e9   :  { %v432_v2 = vmul.f32 %v3572_v35, %v3572_v35  ;;  %v652_v36 = vmul.f32 %v2512_v9, %v2512_v9  ;;  %v447_v9 = vmul.f32 %v3544_v27, %v3544_v27 }
 0x1ea   :  { %1073 = vmatpush1.bf16.xpose.msra.mxu0 %v1072_v10  ;;  %v3565_v10 = vld [vmem:[#allocation52_spill] sm:$0xff] }
 0x1eb   :  { %1075 = vmatprep.subr.bf16.mxu0 %v1074_v7  ;;  %v629_v43 = vmul.f32 %v3565_v10, %v3565_v10  ;;  %v429_v7 = vmul.f32 %v3509_v0, %v3509_v0  ;;  %v633_v0 = vmul.f32 %v3569_v6, %v3569_v6  ;;  %v3573_v10 = vld [vmem:[#allocation64_spill] sm:$0xff]  ;;  %v648_v6 = vmul.f32 %v3534_v11, %v3534_v11 }
 0x1ec   :  { %1137 = vmatpush1.bf16.xpose.msra.mxu1 %v1136_v53  ;;  %v3566_v53 = vld [vmem:[#allocation53_spill] sm:$0xff]  ;;  %v637_v17 = vmul.f32 %v3573_v10, %v3573_v10  ;;  %v443_v11 = vmul.f32 %v3537_v60, %v3537_v60 }
 0x1ed   :  { %1139 = vmatprep.subr.bf16.mxu1 %v1138_v51  ;;  %v631_v18 = vmul.f32 %v3566_v53, %v3566_v53  ;;  %v634_v51 = vmul.f32 %v3507_v50, %v3507_v50  ;;  %v1082_v3 = vpack.c.bf16 %v429_v7, %v427_v32  ;;  %v635_v50 = vmul.f32 %v3570_v58, %v3570_v58 }
 0x1ee   :  { %v437_v53 = vmul.f32 %v3525_v40, %v3525_v40  ;;  %v644_v32 = vmul.f32 %v3526_v29, %v3526_v29  ;;  %v1088_v7 = vpack.c.bf16 %v432_v2, %v430_v16  ;;  %v641_v40 = vmul.f32 %v3577_v19, %v3577_v19  ;;  %v3590_v19 = vld [vmem:[#allocation89_spill] sm:$0xff] }
 0x1ef   :  { %v1144_v4 = vpack.c.bf16 %v631_v18, %v629_v43  ;;  %v1146_v34 = vpack.c.bf16 %v636_v1, %v634_v51  ;;  %v3574_v43 = vld [vmem:[#allocation65_spill] sm:$0xff]  ;;  %v642_v18 = vmul.f32 %v3523_v54, %v3523_v54  ;;  %v439_v29 = vmul.f32 %v3530_v63, %v3530_v63 }
 0x1f0   :  { %v639_v38 = vmul.f32 %v3574_v43, %v3574_v43 }
 0x1f2   :  { %1077 = vmatpush1.bf16.xpose.msra.mxu0 %v1076_v39  ;;  %v640_v39 = vmul.f32 %v3518_v26, %v3518_v26  ;;  %v435_v26 = vmul.f32 %v3522_v48, %v3522_v48  ;;  %v1152_v51 = vpack.c.bf16 %v639_v38, %v637_v17  ;;  %v3583_v17 = vld [vmem:[#allocation108_spill] sm:$0xff]  ;;  %v3584_v38 = vld [vmem:[#allocation109_spill] sm:$0xff] }
 0x1f3   :  { %1079 = vmatprep.subr.bf16.mxu0 %v1078_v41  ;;  %v1148_v41 = vpack.c.bf16 %v635_v50, %v633_v0  ;;  %v1094_v50 = vpack.c.bf16 %v441_v33, %v439_v29  ;;  %v442_v43 = vmul.f32 %v3583_v17, %v3583_v17  ;;  %v444_v60 = vmul.f32 %v3584_v38, %v3584_v38  ;;  %v3628_v38 = vld [vmem:[#allocation129_spill] sm:$0xff] }
 0x1f4   :  { %1141 = vmatpush1.bf16.xpose.msra.mxu1 %v1140_v5  ;;  %v1084_v5 = vpack.c.bf16 %v428_v49, %v426_v24  ;;  %v1150_v46 = vpack.c.bf16 %v640_v39, %v638_v15  ;;  %v1090_v1 = vpack.c.bf16 %v437_v53, %v435_v26  ;;  %v3578_v24 = vld [vmem:[#allocation71_spill] sm:$0xff]  ;;  %v646_v49 = vmul.f32 %v3531_v42, %v3531_v42  ;;  %v3585_v26 = vld [vmem:[#allocation82_spill] sm:$0xff] }
 0x1f5   :  { %1143 = vmatprep.subr.bf16.mxu1 %v1142_v47  ;;  %v1086_v47 = vpack.c.bf16 %v433_v13, %v431_v22  ;;  %v643_v54 = vmul.f32 %v3578_v24, %v3578_v24  ;;  %v3579_v13 = vld [vmem:[#allocation106_spill] sm:$0xff]  ;;  %v3580_v39 = vld [vmem:[#allocation107_spill] sm:$0xff]  ;;  %v3592_v29 = vmov 1.0   ;;  %v3593_v33 = vpack.c.bf16 %v3470_v23, %v3469_v37 }
 0x1f6   :  { %v1158_v22 = vpack.c.bf16 %v648_v6, %v646_v49  ;;  %v438_v15 = vmul.f32 %v3579_v13, %v3579_v13  ;;  %v440_v63 = vmul.f32 %v3580_v39, %v3580_v39  ;;  %v3586_v53 = vld [vmem:[#allocation83_spill] sm:$0xff]  ;;  %v3594_v49 = vpack.c.bf16 %v2548_v31, %v2544_v55  ;;  %v3600_v23 = vld [vmem:[#allocation66_spill] sm:$0xff]  ;;  %v3604_v13 = vld [vmem:[#allocation121_spill] sm:$0xff] }
 0x1f7   :  { %v1156_v58 = vpack.c.bf16 %v643_v54, %v641_v40  ;;  %v3591_v54 = vpack.c.bf16 %v2190_v8, %v2188_v57  ;;  %v3595_v6 = vpack.c.bf16 %v3472_v45, %v3471_v28  ;;  %v3596_v8 = vpack.c.bf16 %v2558_v30, %v2554_v14  ;;  %v3597_v57 = vld [vmem:[#allocation120_spill] sm:$0xff]  ;;  %v3610_v39 = vld [vmem:[#allocation123_spill] sm:$0xff]  ;;  %v3612_v30 = vld [vmem:[#allocation26_spill] sm:$0xff] }
 0x1f8   :  { %v1096_v16 = vpack.c.bf16 %v440_v63, %v438_v15  ;;  %v3606_v31 = vld [vmem:[#allocation72_spill] sm:$0xff]  ;;  %v3607_v15 = vld [vmem:[#allocation67_spill] sm:$0xff]  ;;  %v3613_v63 = vld [vmem:[#allocation25_spill] sm:$0xff] }
 0x1f9   :  { %v3608_v28 = vpack.c.bf16 %v3606_v31, %v3607_v15  ;;  %v3609_v45 = vld [vmem:[#allocation124_spill] sm:$0xff] }
 0x1fa   :  { %1081 = vmatpush1.bf16.xpose.msra.mxu0 %v1080_v56  ;;  %v1154_v56 = vpack.c.bf16 %v644_v32, %v642_v18  ;;  %v449_v18 = vmul.f32 %v3547_v20, %v3547_v20  ;;  %v654_v32 = vmul.f32 %v3545_v52, %v3545_v52  ;;  %v3589_v20 = vld [vmem:[#allocation88_spill] sm:$0xff]  ;;  %v3611_v14 = vpack.c.bf16 %v3609_v45, %v3610_v39  ;;  %v3670_v39 = vld [vmem:[#allocation51_spill] sm:$0xff] }
 0x1fb   :  { %1083 = vmatprep.subr.bf16.mxu0 %v1082_v3  ;;  %v653_v52 = vmul.f32 %v3589_v20, %v3589_v20  ;;  %v3646_v20 = vld [vmem:[#allocation135_spill] sm:$0xff]  ;;  %v3667_v15 = vld [vmem:[#allocation144_spill] sm:$0xff] }
 0x1fc   :  { %1145 = vmatpush1.bf16.xpose.msra.mxu1 %v1144_v4  ;;  %v3575_v4 = vld [vmem:[#allocation104_spill] sm:$0xff] }
 0x1fd   :  { %1147 = vmatprep.subr.bf16.mxu1 %v1146_v34  ;;  %v434_v3 = vmul.f32 %v3575_v4, %v3575_v4  ;;  %v3576_v34 = vld [vmem:[#allocation105_spill] sm:$0xff] }
 0x1fe   :  { %v436_v48 = vmul.f32 %v3576_v34, %v3576_v34 }
 0x200   :  { %v1092_v0 = vpack.c.bf16 %v436_v48, %v434_v3  ;;  %v3587_v3 = vld [vmem:[#allocation110_spill] sm:$0xff]  ;;  %v3588_v48 = vld [vmem:[#allocation111_spill] sm:$0xff] }
 0x201   :  { %v446_v34 = vmul.f32 %v3587_v3, %v3587_v3  ;;  %v448_v27 = vmul.f32 %v3588_v48, %v3588_v48  ;;  %v3642_v3 = vld [vmem:[#allocation37_spill] sm:$0xff] }
 0x202   :  { %1085 = vmatpush1.bf16.xpose.msra.mxu0 %v1084_v5  ;;  %v3581_v5 = vld [vmem:[#allocation76_spill] sm:$0xff] }
 0x203   :  { %1087 = vmatprep.subr.bf16.mxu0 %v1086_v47  ;;  %v645_v21 = vmul.f32 %v3581_v5, %v3581_v5  ;;  %v445_v47 = vmul.f32 %v3540_v59, %v3540_v59  ;;  %v649_v59 = vmul.f32 %v3585_v26, %v3585_v26  ;;  %v1104_v40 = vpack.c.bf16 %v448_v27, %v446_v34  ;;  %v3630_v26 = vld [vmem:[#allocation29_spill] sm:$0xff]  ;;  %v3643_v34 = vld [vmem:[#allocation34_spill] sm:$0xff]  ;;  %v3645_v27 = vld [vmem:[#allocation136_spill] sm:$0xff] }
 0x204   :  { %1149 = vmatpush1.bf16.xpose.msra.mxu1 %v1148_v41  ;;  %v3582_v41 = vld [vmem:[#allocation77_spill] sm:$0xff]  ;;  %v3614_v5 = vpack.c.bf16 %v3612_v30, %v3613_v63  ;;  %v3644_v48 = vpack.c.bf16 %v3642_v3, %v3643_v34  ;;  %v3672_v30 = vld [vmem:[#allocation146_spill] sm:$0xff] }
 0x205   :  { %1151 = vmatprep.subr.bf16.mxu1 %v1150_v46  ;;  %v647_v42 = vmul.f32 %v3582_v41, %v3582_v41  ;;  %v650_v46 = vmul.f32 %v3538_v25, %v3538_v25  ;;  %v1098_v2 = vpack.c.bf16 %v445_v47, %v443_v11  ;;  %v651_v25 = vmul.f32 %v3586_v53, %v3586_v53  ;;  %v3616_v41 = vld [vmem:[#allocation125_spill] sm:$0xff]  ;;  %v3618_v11 = vld [vmem:[#allocation78_spill] sm:$0xff] }
 0x206   :  { %v3619_v47 = vld [vmem:[#allocation73_spill] sm:$0xff] }
 0x207   :  { %v1160_v35 = vpack.c.bf16 %v647_v42, %v645_v21  ;;  %v1162_v10 = vpack.c.bf16 %v652_v36, %v650_v46  ;;  %v3615_v21 = vld [vmem:[#allocation126_spill] sm:$0xff]  ;;  %v3620_v46 = vpack.c.bf16 %v3618_v11, %v3619_v47  ;;  %v3621_v36 = vld [vmem:[#allocation128_spill] sm:$0xff]  ;;  %v3673_v63 = vld [vmem:[#allocation145_spill] sm:$0xff] }
 0x208   :  { %v3617_v42 = vpack.c.bf16 %v3615_v21, %v3616_v41 }
 0x20a   :  { %1089 = vmatpush1.bf16.xpose.msra.mxu0 %v1088_v7  ;;  %v656_v7 = vmul.f32 %v2520_v12, %v2520_v12  ;;  %v655_v12 = vmul.f32 %v3590_v19, %v3590_v19  ;;  %v3648_v19 = vld [vmem:[#allocation41_spill] sm:$0xff] }
 0x20b   :  { %1091 = vmatprep.subr.bf16.mxu0 %v1090_v1  ;;  %v1164_v1 = vpack.c.bf16 %v651_v25, %v649_v59  ;;  %v3631_v59 = vld [vmem:[#allocation85_spill] sm:$0xff]  ;;  %v3633_v25 = vld [vmem:[#allocation132_spill] sm:$0xff] }
 0x20c   :  { %1153 = vmatpush1.bf16.xpose.msra.mxu1 %v1152_v51  ;;  %v1100_v51 = vpack.c.bf16 %v444_v60, %v442_v43  ;;  %v1166_v4 = vpack.c.bf16 %v656_v7, %v654_v32  ;;  %v1168_v24 = vpack.c.bf16 %v655_v12, %v653_v52  ;;  %v3627_v43 = vld [vmem:[#allocation130_spill] sm:$0xff]  ;;  %v3632_v53 = vpack.c.bf16 %v3630_v26, %v3631_v59  ;;  %v3636_v32 = vld [vmem:[#allocation33_spill] sm:$0xff] }
 0x20d   :  { %1155 = vmatprep.subr.bf16.mxu1 %v1154_v56  ;;  %v1102_v56 = vpack.c.bf16 %v449_v18, %v447_v9  ;;  %v3629_v60 = vpack.c.bf16 %v3627_v43, %v3628_v38  ;;  %v3634_v9 = vld [vmem:[#allocation131_spill] sm:$0xff]  ;;  %v3637_v7 = vld [vmem:[#allocation30_spill] sm:$0xff]  ;;  %v3647_v52 = vpack.c.bf16 %v3645_v27, %v3646_v20 }
 0x20e   :  { %v3635_v18 = vpack.c.bf16 %v3633_v25, %v3634_v9  ;;  %v3649_v12 = vld [vmem:[#allocation38_spill] sm:$0xff] }
 0x212   :  { %1093 = vmatpush1.bf16.xpose.msra.mxu0 %v1092_v0  ;;  %v3598_v0 = vld [vmem:[#allocation119_spill] sm:$0xff] }
 0x213   :  { %1095 = vmatprep.subr.bf16.mxu0 %v1094_v50  ;;  %v3599_v37 = vpack.c.bf16 %v3597_v57, %v3598_v0  ;;  %v3657_v57 = vld [vmem:[#allocation140_spill] sm:$0xff]  ;;  %v3658_v0 = vld [vmem:[#allocation139_spill] sm:$0xff] }
 0x214   :  { %1157 = vmatpush1.bf16.xpose.msra.mxu1 %v1156_v58  ;;  %v3601_v58 = vld [vmem:[#allocation61_spill] sm:$0xff] }
 0x215   :  { %1159 = vmatprep.subr.bf16.mxu1 %v1158_v22  ;;  %v3602_v50 = vpack.c.bf16 %v3600_v23, %v3601_v58  ;;  %v3603_v22 = vld [vmem:[#allocation122_spill] sm:$0xff] }
 0x216   :  { %v3605_v55 = vpack.c.bf16 %v3603_v22, %v3604_v13  ;;  %v3660_v23 = vld [vmem:[#allocation46_spill] sm:$0xff]  ;;  %v3663_v22 = vld [vmem:[#allocation141_spill] sm:$0xff] }
 0x217   :  { %v3661_v58 = vpack.c.bf16 %v2690_v62, %v3660_v23  ;;  %v3674_v62 = vpack.c.bf16 %v3672_v30, %v3673_v63 }
 0x21a   :  { %1097 = vmatpush1.bf16.xpose.msra.mxu0 %v1096_v16  ;;  %v3622_v16 = vld [vmem:[#allocation127_spill] sm:$0xff] }
 0x21b   :  { %1099 = vmatprep.subr.bf16.mxu0 %v1098_v2  ;;  %v3624_v2 = vld [vmem:[#allocation84_spill] sm:$0xff] }
 0x21c   :  { %1161 = vmatpush1.bf16.xpose.msra.mxu1 %v1160_v35  ;;  %v3623_v35 = vpack.c.bf16 %v3621_v36, %v3622_v16  ;;  %v1322_v36 = vmov 1966171168  }
 0x21d   :  { %1163 = vmatprep.subr.bf16.mxu1 %v1162_v10  ;;  %v3625_v10 = vld [vmem:[#allocation79_spill] sm:$0xff]  ;;  %v879_v16 = vunpack.c.l.s4 %v1322_v36 }
 0x21e   :  { %v3626_v17 = vpack.c.bf16 %v3624_v2, %v3625_v10 }
 0x21f   :  { %v880_v38 = vunpack.c.0.s8 %v879_v16 }
 0x222   :  { %1101 = vmatpush1.bf16.xpose.msra.mxu0 %v1100_v51  ;;  %v3638_v51 = vpack.c.bf16 %v3636_v32, %v3637_v7  ;;  %v3676_v32 = vlaneseq }
 0x223   :  { %1103 = vmatprep.subr.bf16.mxu0 %v1102_v56  ;;  %v3640_v56 = vld [vmem:[#allocation133_spill] sm:$0xff] }
 0x224   :  { %1165 = vmatpush1.bf16.xpose.msra.mxu1 %v1164_v1  ;;  %v3639_v1 = vld [vmem:[#allocation134_spill] sm:$0xff]  ;;  %vm895_vm0 = vcmp.lt.s32.totalorder %v3676_v32, 256 }
 0x225   :  { %1167 = vmatprep.subr.bf16.mxu1 %v1166_v4  ;;  %v3641_v4 = vpack.c.bf16 %v3639_v1, %v3640_v56 }
 0x22a   :  { %1105 = vmatpush1.bf16.xpose.msra.mxu0 %v1104_v40  ;;  %v3650_v40 = vpack.c.bf16 %v3648_v19, %v3649_v12 }
 0x22b   :  { %1171 = vmatprep.subr.bf16.mxu0 %v3591_v54  ;;  %v3652_v54 = vld [vmem:[#allocation137_spill] sm:$0xff] }
 0x22c   :  { %1169 = vmatpush1.bf16.xpose.msra.mxu1 %v1168_v24  ;;  %v3651_v24 = vld [vmem:[#allocation138_spill] sm:$0xff] }
 0x231   :  { %515 = vmatmul.mubr.f32.vlgmr.msra.gmra.mrb[2].mxu0 %v3592_v29 }
 0x232   :  { %1173 = vmatpush1.bf16.xpose.msra.mxu0 %v3593_v33  ;;  %856 = vmatprep.mubr.f32.mxu0 %v3592_v29  ;;  %v3653_v33 = vpack.c.bf16 %v3651_v24, %v3652_v54 }
 0x233   :  { %722 = vmatmul.mubr.f32.vlgmr.msra.gmra.mrb[2].mxu1 %v3592_v29  ;;  %1175 = vmatprep.subr.bf16.mxu0 %v3594_v49  ;;  %v3654_v49 = vld [vmem:[#allocation45_spill] sm:$0xff] }
 0x23a   :  { %1177 = vmatpush1.bf16.xpose.msra.mxu0 %v3595_v6  ;;  %v3655_v6 = vld [vmem:[#allocation42_spill] sm:$0xff] }
 0x23b   :  { %1179 = vmatprep.subr.bf16.mxu0 %v3596_v8  ;;  %v3656_v8 = vpack.c.bf16 %v3654_v49, %v3655_v6 }
 0x242   :  { %1181 = vmatpush1.bf16.xpose.msra.mxu0 %v3599_v37  ;;  %v3659_v37 = vpack.c.bf16 %v3657_v57, %v3658_v0 }
 0x243   :  { %1183 = vmatprep.subr.bf16.mxu0 %v3602_v50  ;;  %v3662_v50 = vld [vmem:[#allocation142_spill] sm:$0xff] }
 0x244   :  { %v3664_v13 = vpack.c.bf16 %v3662_v50, %v3663_v22 }
 0x24a   :  { %1185 = vmatpush1.bf16.xpose.msra.mxu0 %v3605_v55  ;;  %v3665_v55 = vld [vmem:[#allocation50_spill] sm:$0xff] }
 0x24b   :  { %1187 = vmatprep.subr.bf16.mxu0 %v3608_v28  ;;  %v3666_v31 = vpack.c.bf16 %v2702_v44, %v3665_v55  ;;  %v3668_v28 = vld [vmem:[#allocation143_spill] sm:$0xff] }
 0x24c   :  { %v3669_v45 = vpack.c.bf16 %v3667_v15, %v3668_v28 }
 0x252   :  { %1189 = vmatpush1.bf16.xpose.msra.mxu0 %v3611_v14  ;;  %v3671_v14 = vpack.c.bf16 %v2717_v61, %v3670_v39 }
 0x253   :  { %1191 = vmatprep.subr.bf16.mxu0 %v3614_v5 }
 0x25a   :  { %1193 = vmatpush1.bf16.xpose.msra.mxu0 %v3617_v42 }
 0x25b   :  { %1195 = vmatprep.subr.bf16.mxu0 %v3620_v46 }
 0x262   :  { %1197 = vmatpush1.bf16.xpose.msra.mxu0 %v3623_v35 }
 0x263   :  { %1199 = vmatprep.subr.bf16.mxu0 %v3626_v17 }
 0x26a   :  { %1201 = vmatpush1.bf16.xpose.msra.mxu0 %v3629_v60 }
 0x26b   :  { %1203 = vmatprep.subr.bf16.mxu0 %v3632_v53  ;;  %v3675_v53 = vld [vmem:[#allocation90_spill] sm:$0xff] }
 0x26c   :  { %v883_v25 = vsub.s32 %v880_v38, %v3675_v53 }
 0x272   :  { %1205 = vmatpush1.bf16.xpose.msra.mxu0 %v3635_v18 }
 0x273   :  { %1207 = vmatprep.subr.bf16.mxu0 %v3638_v51 }
 0x27a   :  { %1209 = vmatpush1.bf16.xpose.msra.mxu0 %v3641_v4 }
 0x27b   :  { %1211 = vmatprep.subr.bf16.mxu0 %v3644_v48 }
 0x282   :  { %1213 = vmatpush1.bf16.xpose.msra.mxu0 %v3647_v52 }
 0x283   :  { %1215 = vmatprep.subr.bf16.mxu0 %v3650_v40 }
 0x28a   :  { %1217 = vmatpush1.bf16.xpose.msra.mxu0 %v3653_v33 }
 0x28b   :  { %1219 = vmatprep.subr.bf16.mxu0 %v3656_v8 }
 0x292   :  { %1221 = vmatpush1.bf16.xpose.msra.mxu0 %v3659_v37 }
 0x293   :  { %1223 = vmatprep.subr.bf16.mxu0 %v3661_v58 }
 0x29a   :  { %1225 = vmatpush1.bf16.xpose.msra.mxu0 %v3664_v13 }
 0x29b   :  { %1227 = vmatprep.subr.bf16.mxu0 %v3666_v31 }
 0x2a2   :  { %1229 = vmatpush1.bf16.xpose.msra.mxu0 %v3669_v45 }
 0x2a3   :  { %1231 = vmatprep.subr.bf16.mxu0 %v3671_v14 }
 0x2aa   :  { %1233 = vmatpush1.bf16.xpose.msra.mxu0 %v3674_v62 }
 0x2b1   :  { %857 = vmatmul.mubr.f32.vlgmr.msra.gmra.mrb[4].mxu0 %v3592_v29 }
 0x304   :  { %v516_v5 = vpop.f32.mrb[2].mxu0 }
 0x305   :  { %v518_v21 = vpop.f32.mrb[3].mxu0 }
 0x306   :  { %v723_v41 = vpop.f32.mrb[2].mxu1 }
 0x307   :  { %v863_v42 = vmul.f32 %v723_v41, %v516_v5  ;;  %v725_v44 = vpop.f32.mrb[3].mxu1 }
 0x308   :  { %v864_v11 = vmul.f32 %v725_v44, %v518_v21 }
 0x309   :  { %v865_v47 = vmax.f32 %v863_v42, 1e-16 }
 0x30a   :  { %v866_v46 = vmax.f32 %v864_v11, 1e-16 }
 0x30b   :  { %1241 = vrsqrt.f32 %v865_v47 }
 0x30c   :  { %1243 = vrsqrt.f32 %v866_v46 }
 0x315   :  { %v1242_v61 = vpop.eup %1241 }
 0x316   :  { %v1244_v2 = vpop.eup %1243 }
 0x384   :  { %v858_v35 = vpop.f32.mrb[4].mxu0 }
 0x385   :  { %v869_v10 = vmul.f32 %v1242_v61, %v858_v35  ;;  %v860_v17 = vpop.f32.mrb[5].mxu0 }
 0x386   :  { %v870_v43 = vmul.f32 %v1244_v2, %v860_v17 }
 0x387   :  { %v871_v29 = vadd.f32 1.0, %v869_v10 }
 0x388   :  { %v872_v60 = vadd.f32 1.0, %v870_v43 }
 0x389   :  { %v873_v26 = vmul.f32 0.5, %v871_v29 }
 0x38a   :  { %v874_v59 = vmul.f32 0.5, %v872_v60 }
 0x38c   :  { %v877_v9 = vcombine.low %v873_v26, %v874_v59 }
 0x38e   :  { %v884_v18 = vrot.slane %v877_v9, %v883_v25 }
 0x390   :  { %v891_v7 = vrot.slane %v884_v18, %v883_v25 }
 0x392   :  { %897 = vst.msk [vmem:[#allocation7] sm:$0x3] %vm895_vm0, %v891_v7 }
 0x393   :  { %1300 = shalt.err (!%p1297_p6)
}
 0x394   :  { %s1301_s10 = scalar_lea.hbm %s2991_s2, 32 }
 0x395   :  { %p1302_p7 = scmp.ne.s32.totalorder %s2991_s2, %s1301_s10  ;;  %p1305_p8 = scmp.lt.u32.totalorder %s1301_s10, %s2991_s2 }
 0x397   :  { %p1307_p9 = pnand %p1305_p8, %p1302_p7 }
 0x399   :  { %1310 = shalt.err (!%p1307_p9)
}
 0x39a   :  { %907 = dma.vmem_to_hbm [thread:$0]  %s905_s6, 32, %s2991_s2, [#allocation4]  }
 0x39b   :  { %1315 = dma.done.wait [#allocation4], 32  }
 0x39c   :  { %1316 = vsyncadd [#allocation4], 4294967264 }
 0x39d   :  { %911 = vsyncpa [#allocation3], 1 }
 0x39e   :  { %912 = vsyncpa [#allocation6], 1 }
 0x39f   :  { %913 = vsyncpa [#allocation4], 1 }

</bundles_post_ra>
